<compile_context>
chip_gen: v6e
topology: v6e:2x2x1
jax: 0.10.0
libtpu: 0.0.40
codegen_flags: <defaults>
</compile_context>

<pallas_src>
import functools
import math

import jax
import jax.numpy as jnp
from jax.experimental import pallas as pl
from jax.experimental.pallas import tpu as pltpu

_NEG = -1e30
_VMEM_LIMIT = 48 * 1024 * 1024   # < v7x 64 MiB physical, > default scoped limit on all gens
_ROW_TILE = 512                  # 512-row tiles ~85% of HBM roofline on mem-bound kernels
_Q_TILE = 256                    # query-tile for the chars-transformer attention


def _bf16(x):
    return x.astype(jnp.bfloat16)


def _dot_nt(a, b):
    # a: (M, K), b: (N, K) -> (M, N): contract the LAST dim of both operands.
    # Avoids an explicit per-head XLU transpose of b; Mosaic feeds the MXU natively.
    return jax.lax.dot_general(a, b, (((1,), (1,)), ((), ())),
                               preferred_element_type=jnp.float32)


def _ln(z, g, b):
    mu = jnp.mean(z, axis=-1, keepdims=True)
    var = jnp.mean((z - mu) ** 2, axis=-1, keepdims=True)
    return (z - mu) * jax.lax.rsqrt(var + 1e-5) * g + b


# -----------------------------------------------------------------------------
# Row-tiled dense kernels
# -----------------------------------------------------------------------------
def _linear_kernel(x_ref, w_ref, b_ref, o_ref):
    o_ref[...] = (jnp.dot(_bf16(x_ref[...]), _bf16(w_ref[...]),
                          preferred_element_type=jnp.float32)
                  + b_ref[...]).astype(o_ref.dtype)


def _two_linear_kernel(x_ref, w1_ref, b1_ref, w2_ref, b2_ref, o_ref):
    # (x@w1+b1)@w2+b2  (word_fc fused with the informer K|V projection)
    h = jnp.dot(_bf16(x_ref[...]), _bf16(w1_ref[...]),
                preferred_element_type=jnp.float32) + b1_ref[...]
    o_ref[...] = (jnp.dot(_bf16(h), _bf16(w2_ref[...]),
                          preferred_element_type=jnp.float32)
                  + b2_ref[...]).astype(o_ref.dtype)


def _linear_logsoftmax_kernel(x_ref, w_ref, b_ref, o_ref):
    # classifier is padded to a lane-dense width; padded cols carry a -1e30 bias
    logits = jnp.dot(_bf16(x_ref[...]), _bf16(w_ref[...]),
                     preferred_element_type=jnp.float32) + b_ref[...]
    m = jnp.max(logits, axis=-1, keepdims=True)
    e = jnp.exp(logits - m)
    o_ref[...] = (logits - m - jnp.log(jnp.sum(e, axis=-1, keepdims=True))
                  ).astype(o_ref.dtype)


# -----------------------------------------------------------------------------
# Fused chars-transformer layer (QKV -> MHA -> out-proj+LN -> FFN+LN) per
# (batch, query-tile).  scale=False in the reference -> no 1/sqrt(dh) scaling.
# -----------------------------------------------------------------------------
def _transformer_kernel(xq_ref, xkv_ref, mask_ref,
                        wqkv_ref, bqkv_ref, wo_ref, bo_ref, g1_ref, beta1_ref,
                        w1_ref, b1_ref, w2_ref, b2_ref, g2_ref, beta2_ref,
                        o_ref, *, n_head):
    H = xkv_ref.shape[2]
    dh = H // n_head
    xq = xq_ref[0]                                        # (Tq, H) f32 (residual path)
    xkv = xkv_ref[0]                                      # (S, H)  f32
    neg = jnp.where(mask_ref[0] > 0.0, 0.0, _NEG)         # (1, S) additive key mask

    wqkv = _bf16(wqkv_ref[...])
    q = jnp.dot(_bf16(xq), wqkv[:, :H],
                preferred_element_type=jnp.float32) + bqkv_ref[:, :H]
    kv = jnp.dot(_bf16(xkv), wqkv[:, H:],
                 preferred_element_type=jnp.float32) + bqkv_ref[:, H:]
    q = _bf16(q)
    kv = _bf16(kv)

    # TODO(synk): key-tiled online softmax for large S (full (Tq,S) scores here).
    outs = []
    for h in range(n_head):
        qh = q[:, h * dh:(h + 1) * dh]
        kh = kv[:, h * dh:(h + 1) * dh]
        vh = kv[:, H + h * dh:H + (h + 1) * dh]
        s = _dot_nt(qh, kh) + neg                         # (Tq, S) f32
        s = s - jnp.max(s, axis=-1, keepdims=True)
        e = jnp.exp(s)
        p = e * pl.reciprocal(jnp.sum(e, axis=-1, keepdims=True), approx=True)
        outs.append(jnp.dot(_bf16(p), vh, preferred_element_type=jnp.float32))
    a = jnp.concatenate(outs, axis=-1)                    # (Tq, H): one dense store path

    # post-norm: LN(x + attn@wo + bo)
    z = xq + jnp.dot(_bf16(a), _bf16(wo_ref[...]),
                     preferred_element_type=jnp.float32) + bo_ref[...]
    z = _ln(z, g1_ref[...], beta1_ref[...])
    # post-norm: LN(z + relu(z@w1+b1)@w2+b2)
    hmid = jnp.maximum(jnp.dot(_bf16(z), _bf16(w1_ref[...]),
                               preferred_element_type=jnp.float32) + b1_ref[...], 0.0)
    z2 = z + jnp.dot(_bf16(hmid), _bf16(w2_ref[...]),
                     preferred_element_type=jnp.float32) + b2_ref[...]
    o_ref[0] = _ln(z2, g2_ref[...], beta2_ref[...]).astype(o_ref.dtype)


def transformer_layer(x, key_mask, p, n_head):
    # one fused pallas_call per (batch element, query tile)
    B, S, H = x.shape
    tq = S if S <= _Q_TILE else _Q_TILE
    grid = (B, pl.cdiv(S, tq))

    def cspec(a):
        return pl.BlockSpec(a.shape, lambda b, qi: (0,) * a.ndim)

    consts = [p['wqkv'], p['bqkv'].reshape(1, -1), p['wo'], p['bo'].reshape(1, -1),
              p['ln1_g'].reshape(1, -1), p['ln1_b'].reshape(1, -1),
              p['w1'], p['b1'].reshape(1, -1), p['w2'], p['b2'].reshape(1, -1),
              p['ln2_g'].reshape(1, -1), p['ln2_b'].reshape(1, -1)]
    return pl.pallas_call(
        functools.partial(_transformer_kernel, n_head=n_head),
        out_shape=jax.ShapeDtypeStruct((B, S, H), jnp.bfloat16),   # consumer casts to bf16
        grid=grid,
        in_specs=[pl.BlockSpec((1, tq, H), lambda b, qi: (b, qi, 0)),   # query / residual tile
                  pl.BlockSpec((1, S, H), lambda b, qi: (b, 0, 0)),     # full rows for K/V
                  pl.BlockSpec((1, 1, S), lambda b, qi: (b, 0, 0))]
                 + [cspec(a) for a in consts],
        out_specs=pl.BlockSpec((1, tq, H), lambda b, qi: (b, qi, 0)),
        compiler_params=pltpu.CompilerParams(
            dimension_semantics=("parallel", "parallel"),
            vmem_limit_bytes=_VMEM_LIMIT),
    )(x, x, key_mask, *consts)


# -----------------------------------------------------------------------------
# Fused InterFormer attention: four-position-fusion FF bias + inter attention
# for one batch element, all heads, one dense output store.
# -----------------------------------------------------------------------------
def _informer_kernel(q_ref, kv_ref, rel_ref, cmask_ref, wmask_ref,
                     w1_ref, b1_ref, w2_ref, b2_ref, o_ref, *, n_head):
    S = q_ref.shape[1]
    W = kv_ref.shape[1]
    nhH = kv_ref.shape[2] // 2
    hd = nhH // n_head
    F = rel_ref.shape[3]

    q = q_ref[0]                                          # (S, H) bf16  (q_proj=False)
    kv = kv_ref[0]                                        # (W, 2*nh*hd) bf16
    cneg = jnp.where(cmask_ref[0] > 0.0, 0.0, _NEG)       # (S, 1) mask on softmax axis
    wmul = wmask_ref[0]                                   # (1, W) zero padded lexicon cols

    # four_pos_fusion='ff': relu(rel @ w1 + b1) @ w2 + b2 -> per-head additive bias.
    rel2 = rel_ref[0].reshape(S * W, F)                   # minor dim unchanged (cheap)
    h1 = jnp.maximum(jnp.dot(rel2, _bf16(w1_ref[...]),
                             preferred_element_type=jnp.float32) + b1_ref[...], 0.0)
    pf = jnp.dot(_bf16(h1), _bf16(w2_ref[...]),
                 preferred_element_type=jnp.float32) + b2_ref[...]   # (S*W, nh)
    pf3 = pf.reshape(S, W, n_head)

    outs = []
    for h in range(n_head):
        kh = kv[:, h * hd:(h + 1) * hd]                   # (W, hd)
        vh = kv[:, nhH + h * hd:nhH + (h + 1) * hd]       # (W, hd)
        s = _dot_nt(q, kh)                                # (S, W) f32
        s = s + pf3[:, :, h] + cneg
        # softmax over axis=-2 (char axis) -- NFLAT's softmax_axis=-2 default
        s = s - jnp.max(s, axis=0, keepdims=True)
        e = jnp.exp(s)
        p = e * pl.reciprocal(jnp.sum(e, axis=0, keepdims=True), approx=True)
        p = p * wmul
        outs.append(jnp.dot(_bf16(p), vh, preferred_element_type=jnp.float32))
    # single lane-dense store (nh*hd lanes) instead of nh masked 8/32-lane stores
    o_ref[0] = jnp.concatenate(outs, axis=-1).astype(o_ref.dtype)


def informer_attn(chars_q, kv_words, rel, cmask_row, wmask, p, n_head):
    B, S, H = chars_q.shape
    W, KV = kv_words.shape[1], kv_words.shape[2]
    F = rel.shape[3]
    nhH = KV // 2

    def cspec(a):
        return pl.BlockSpec(a.shape, lambda b: (0,) * a.ndim)

    consts = [p['pf_w1'], p['pf_b1'].reshape(1, -1),
              p['pf_w2'], p['pf_b2'].reshape(1, -1)]
    return pl.pallas_call(
        functools.partial(_informer_kernel, n_head=n_head),
        out_shape=jax.ShapeDtypeStruct((B, S, nhH), jnp.bfloat16),  # out_fc casts to bf16
        grid=(B,),
        in_specs=[pl.BlockSpec((1, S, H), lambda b: (b, 0, 0)),
                  pl.BlockSpec((1, W, KV), lambda b: (b, 0, 0)),
                  pl.BlockSpec((1, S, W, F), lambda b: (b, 0, 0, 0)),
                  pl.BlockSpec((1, S, 1), lambda b: (b, 0, 0)),
                  pl.BlockSpec((1, 1, W), lambda b: (b, 0, 0))]
                 + [cspec(a) for a in consts],
        out_specs=pl.BlockSpec((1, S, nhH), lambda b: (b, 0, 0)),
        compiler_params=pltpu.CompilerParams(
            dimension_semantics=("parallel",),
            vmem_limit_bytes=_VMEM_LIMIT),
    )(chars_q, kv_words, rel, cmask_row, wmask, *consts)


# -----------------------------------------------------------------------------
# Row-tiled wrappers
# -----------------------------------------------------------------------------
def _row_spec(width, tn):
    return pl.BlockSpec((tn, width), lambda i: (i, 0))


def _const_spec(arr):
    nd = arr.ndim
    return pl.BlockSpec(arr.shape, lambda i: (0,) * nd)


def _rowcall(kernel, row_args, const_args, dout, out_dtype=jnp.float32, *, tile=_ROW_TILE):
    n = row_args[0].shape[0]
    tn = n if n <= tile else tile
    grid = (pl.cdiv(n, tn),)
    in_specs = ([_row_spec(a.shape[1], tn) for a in row_args]
                + [_const_spec(a) for a in const_args])
    return pl.pallas_call(
        kernel,
        out_shape=jax.ShapeDtypeStruct((n, dout), out_dtype),
        grid=grid,
        in_specs=in_specs,
        out_specs=_row_spec(dout, tn),
        compiler_params=pltpu.CompilerParams(
            dimension_semantics=("parallel",),
            vmem_limit_bytes=_VMEM_LIMIT),
    )(*row_args, *const_args)


def linear(x, w, b, out_dtype=jnp.float32):
    lead, din, dout = x.shape[:-1], x.shape[-1], w.shape[1]
    n = math.prod(lead)
    out = _rowcall(_linear_kernel, [x.reshape(n, din)],
                   [w, b.reshape(1, dout)], dout, out_dtype)
    return out.reshape(*lead, dout)


def two_linear(x, w1, b1, w2, b2, out_dtype=jnp.float32):
    lead, din, dout = x.shape[:-1], x.shape[-1], w2.shape[1]
    n = math.prod(lead)
    out = _rowcall(_two_linear_kernel, [x.reshape(n, din)],
                   [w1, b1.reshape(1, -1), w2, b2.reshape(1, -1)], dout, out_dtype)
    return out.reshape(*lead, dout)


def linear_logsoftmax(x, w, b):
    lead, din, dout = x.shape[:-1], x.shape[-1], w.shape[1]
    n = math.prod(lead)
    out = _rowcall(_linear_logsoftmax_kernel, [x.reshape(n, din)],
                   [w, b.reshape(1, dout)], dout, jnp.float32)
    return out.reshape(*lead, dout)


# -----------------------------------------------------------------------------
# Model
# -----------------------------------------------------------------------------
def informer_layer(chars, kv_words, pos_s, pos_e, lex_s, lex_e,
                   cmask_row, wmask, p, n_head, max_len):
    # InterFormer: chars (queries, q_proj=False) attend over matched words (K/V).
    pe = p['pe']

    def dist(a, b):
        return jnp.clip(a[:, :, None] - b[:, None, :], -max_len, max_len) + max_len

    # TODO(synk): pe gather stays in XLA (embedding gather); FF + transpose fused in-kernel.
    rel = jnp.concatenate(
        [pe[dist(pos_s, lex_s)], pe[dist(pos_s, lex_e)],
         pe[dist(pos_e, lex_s)], pe[dist(pos_e, lex_e)]],
        axis=-1).astype(jnp.bfloat16)                     # (B,S,W,4*Dpe), bf16 HBM traffic
    # TODO(synk): matrix_label-supervised auxiliary loss (loss_new) not implemented.
    return informer_attn(chars, kv_words, rel, cmask_row, wmask, p, n_head)


def nflat_forward(p, cfg, chars_ids, target, words_ids,
                  pos_s, pos_e, lex_s, lex_e, seq_len, lex_num):
    del target, seq_len   # target only used by CRF loss / vocab string matching (TODO)
    B, S = chars_ids.shape
    W = words_ids.shape[1]
    nh = cfg['n_head']

    chars_mask = chars_ids != 0
    word_mask = jnp.arange(W)[None, :] < lex_num[:, None]
    cmask_key = chars_mask.astype(jnp.float32).reshape(B, 1, S)   # MHA key mask
    cmask_row = chars_mask.astype(jnp.float32).reshape(B, S, 1)   # informer char-axis mask
    wmask = word_mask.astype(jnp.float32).reshape(B, 1, W)

    chars = jnp.take(p['char_embed'], chars_ids, axis=0)          # embedding gather (glue)
    words = jnp.take(p['word_embed'], words_ids, axis=0)
    # char_dropout / word_dropout / attn dropout: identity (inference)
    chars = linear(chars, p['char_fc_w'], p['char_fc_b'])         # (B,S,H) f32 (residual/LN)

    # before=True: masked_fill + chars_transformer first (fused single pallas_call)
    chars = chars * chars_mask[..., None].astype(chars.dtype)
    chars = transformer_layer(chars, cmask_key, p['tr'], nh)      # num_layers=1, bf16 out

    # word_fc fused with informer K|V projection (k_proj=True, v_proj=True); bf16 out
    kv_words = two_linear(words, p['word_fc_w'], p['word_fc_b'],
                          p['inf']['wkv'], p['inf']['bkv'],
                          out_dtype=jnp.bfloat16)                  # (B,W,2*nh*H)

    chars = informer_layer(chars, kv_words, pos_s, pos_e, lex_s, lex_e,
                           cmask_row, wmask, p['inf'], nh,
                           cfg['max_seq_len'])                     # (B,S,nh*H) bf16

    # self.fc_dropout(chars) in the reference does not reassign -> no-op
    # classifier padded to a lane-dense 128-wide output; slice real tags afterwards
    n_tags = cfg['n_tags']
    pad = 128 * pl.cdiv(n_tags, 128)
    w_pad = jnp.zeros((chars.shape[-1], pad), jnp.float32).at[:, :n_tags].set(p['out_fc_w'])
    b_pad = jnp.full((pad,), _NEG, jnp.float32).at[:n_tags].set(p['out_fc_b'])
    logp = linear_logsoftmax(chars, w_pad, b_pad)[..., :n_tags]    # (B,S,n_tags)
    # TODO(synk): CRF Viterbi decode / CRF loss omitted; greedy argmax as 'pred'.
    pred = jnp.argmax(logp, axis=-1)
    return {'log_probs': logp, 'pred': pred}


# -----------------------------------------------------------------------------
# Deterministic parameter init
# -----------------------------------------------------------------------------
def init_params(key, cfg):
    ks = jax.random.split(key, 12)
    w = lambda i, shape: jax.random.normal(ks[i], shape, jnp.float32) * 0.02
    H, nh, ff_dim, dpe = cfg['hidden'], cfg['n_head'], cfg['ff'], cfg['pe_dim']
    max_len = cfg['max_seq_len']

    p = {
        'char_embed': w(0, (cfg['char_vocab'], cfg['char_emb'])),
        'word_embed': w(1, (cfg['word_vocab'], cfg['word_emb'])),
        'char_fc_w': w(2, (cfg['char_emb'], H)), 'char_fc_b': jnp.zeros((H,), jnp.float32),
        'word_fc_w': w(3, (cfg['word_emb'], H)), 'word_fc_b': jnp.zeros((H,), jnp.float32),
        'out_fc_w': w(4, (nh * H, cfg['n_tags'])),
        'out_fc_b': jnp.zeros((cfg['n_tags'],), jnp.float32),
    }
    p['tr'] = {
        'wqkv': w(5, (H, 3 * H)), 'bqkv': jnp.zeros((3 * H,), jnp.float32),
        'wo': w(6, (H, H)), 'bo': jnp.zeros((H,), jnp.float32),
        'ln1_g': jnp.ones((H,), jnp.float32), 'ln1_b': jnp.zeros((H,), jnp.float32),
        'w1': w(7, (H, ff_dim)), 'b1': jnp.zeros((ff_dim,), jnp.float32),
        'w2': w(8, (ff_dim, H)), 'b2': jnp.zeros((H,), jnp.float32),
        'ln2_g': jnp.ones((H,), jnp.float32), 'ln2_b': jnp.zeros((H,), jnp.float32),
    }
    # sinusoidal relative-position table over distances in [-max_len, max_len]
    pos = jnp.arange(2 * max_len + 1, dtype=jnp.float32)[:, None] - max_len
    div = jnp.exp(jnp.arange(0, dpe, 2, dtype=jnp.float32) * (-jnp.log(10000.0) / dpe))
    pe = jnp.zeros((2 * max_len + 1, dpe), jnp.float32)
    pe = pe.at[:, 0::2].set(jnp.sin(pos * div)).at[:, 1::2].set(jnp.cos(pos * div))
    p['inf'] = {
        'pe': pe,
        'pf_w1': w(9, (4 * dpe, dpe)), 'pf_b1': jnp.zeros((dpe,), jnp.float32),
        'pf_w2': w(10, (dpe, nh)), 'pf_b2': jnp.zeros((nh,), jnp.float32),
        'wkv': w(11, (H, 2 * nh * H)), 'bkv': jnp.zeros((2 * nh * H,), jnp.float32),
    }
    return p


# -----------------------------------------------------------------------------
if __name__ == "__main__":
    # Config mirrors NFLAT.__init__: hidden_size=128, n_head=4 -> hidden=128//4=32,
    # feedforward_dim=256 -> 64, num_layers=1, is_less_head=1, max_seq_len=16.
    cfg = dict(char_vocab=50, word_vocab=60, char_emb=32, word_emb=32,
               hidden=32, n_head=4, ff=64, n_tags=6, max_seq_len=16, pe_dim=32)

    key = jax.random.PRNGKey(0)
    k_ids, k_par = jax.random.split(key)
    B, S, W = 2, 8, 8

    kc, kw, kt, kls, kle = jax.random.split(k_ids, 5)
    chars = jax.random.randint(kc, (B, S), 1, cfg['char_vocab'], dtype=jnp.int32)
    chars = chars.at[1, 6:].set(0)                      # padding -> seq_len [8, 6]
    words = jax.random.randint(kw, (B, W), 1, cfg['word_vocab'], dtype=jnp.int32)
    words = words.at[1, 5:].set(0)                      # padding -> lex_num [8, 5]
    target = jax.random.randint(kt, (B, S), 0, cfg['n_tags'], dtype=jnp.int32)
    pos_s = jnp.broadcast_to(jnp.arange(S, dtype=jnp.int32)[None, :], (B, S))
    pos_e = pos_s
    lex_s = jax.random.randint(kls, (B, W), 0, S, dtype=jnp.int32)
    lex_e = jnp.minimum(lex_s + jax.random.randint(kle, (B, W), 1, 3, dtype=jnp.int32), S - 1)
    seq_len = jnp.array([8, 6], jnp.int32)
    lex_num = jnp.array([8, 5], jnp.int32)

    params = init_params(k_par, cfg)

    @jax.jit
    def fwd(pp, chars, target, words, pos_s, pos_e, lex_s, lex_e, seq_len, lex_num):
        return nflat_forward(pp, cfg, chars, target, words,
                             pos_s, pos_e, lex_s, lex_e, seq_len, lex_num)

    out = fwd(params, chars, target, words, pos_s, pos_e, lex_s, lex_e, seq_len, lex_num)
    jax.block_until_ready(out)

    assert out['log_probs'].shape == (B, S, cfg['n_tags'])
    assert out['pred'].shape == (B, S)
    assert bool(jnp.all(jnp.isfinite(out['log_probs'])))
    print("KERNEL_OK")
</pallas_src>

<mosaic_0001>
module attributes {stable_mosaic.version = 11 : i64} {
  func.func @_linear_kernel(%arg0: i32, %arg1: memref<16x32xf32, #tpu.memory_space<vmem>>, %arg2: memref<32x32xf32, #tpu.memory_space<vmem>>, %arg3: memref<1x32xf32, #tpu.memory_space<vmem>>, %arg4: memref<16x32xf32, #tpu.memory_space<vmem>>) attributes {dimension_semantics = [#tpu.dimension_semantics<parallel>], iteration_bounds = array<i64: 1>, scalar_prefetch = 0 : i64, scratch_operands = 0 : i64, tpu.core_type = #tpu.core_type<tc>, window_params = [{transform_indices = @transform_0, window_bounds = array<i64: 16, 32>}, {pipeline_mode = #tpu.pipeline_mode<synchronous>, transform_indices = @transform_1, window_bounds = array<i64: 32, 32>}, {pipeline_mode = #tpu.pipeline_mode<synchronous>, transform_indices = @transform_2, window_bounds = array<i64: 1, 32>}, {transform_indices = @transform_3, window_bounds = array<i64: 16, 32>}]} {
    %c0 = arith.constant 0 : index
    %c0_0 = arith.constant 0 : index
    %0 = vector.load %arg1[%c0, %c0_0] : memref<16x32xf32, #tpu.memory_space<vmem>>, vector<16x32xf32>
    %1 = arith.truncf %0 : vector<16x32xf32> to vector<16x32xbf16>
    %c0_1 = arith.constant 0 : index
    %c0_2 = arith.constant 0 : index
    %2 = vector.load %arg2[%c0_1, %c0_2] : memref<32x32xf32, #tpu.memory_space<vmem>>, vector<32x32xf32>
    %3 = arith.truncf %2 : vector<32x32xf32> to vector<32x32xbf16>
    %cst = arith.constant dense<0.000000e+00> : vector<16x32xf32>
    %4 = tpu.matmul %1, %3, %cst {dimension_numbers = #tpu.dot_dimension_numbers<[1], [0], [0], [1], [0, 0, 1, 1], [], []>} : vector<16x32xbf16>, vector<32x32xbf16>, vector<16x32xf32> -> vector<16x32xf32>
    %c0_3 = arith.constant 0 : index
    %c0_4 = arith.constant 0 : index
    %5 = vector.load %arg3[%c0_3, %c0_4] : memref<1x32xf32, #tpu.memory_space<vmem>>, vector<1x32xf32>
    %6 = vector.broadcast %5 : vector<1x32xf32> to vector<16x32xf32>
    %7 = arith.addf %4, %6 : vector<16x32xf32>
    %c0_5 = arith.constant 0 : index
    %c0_6 = arith.constant 0 : index
    %8 = vector.load %arg4[%c0_5, %c0_6] : memref<16x32xf32, #tpu.memory_space<vmem>>, vector<16x32xf32>
    tpu.vector_store %arg4[%c0_5, %c0_6], %7 {strides = array<i32>} : memref<16x32xf32, #tpu.memory_space<vmem>>, vector<16x32xf32>,
    return
  }
  func.func @transform_0(%arg0: i32) -> (i32, i32) {
    %c0_i32 = arith.constant 0 : i32
    %c0_i32_0 = arith.constant 0 : i32
    return %arg0, %c0_i32 : i32, i32
  }
  func.func @transform_1(%arg0: i32) -> (i32, i32) {
    %c0_i32 = arith.constant 0 : i32
    %c0_i32_0 = arith.constant 0 : i32
    %c0_i32_1 = arith.constant 0 : i32
    return %c0_i32, %c0_i32_0 : i32, i32
  }
  func.func @transform_2(%arg0: i32) -> (i32, i32) {
    %c0_i32 = arith.constant 0 : i32
    %c0_i32_0 = arith.constant 0 : i32
    %c0_i32_1 = arith.constant 0 : i32
    return %c0_i32, %c0_i32_0 : i32, i32
  }
  func.func @transform_3(%arg0: i32) -> (i32, i32) {
    %c0_i32 = arith.constant 0 : i32
    %c0_i32_0 = arith.constant 0 : i32
    return %arg0, %c0_i32 : i32, i32
  }
}

module attributes {stable_mosaic.version = 11 : i64} {
  func.func @_transformer_kernel(%arg0: i32, %arg1: i32, %arg2: memref<1x8x32xf32, #tpu.memory_space<vmem>>, %arg3: memref<1x8x32xf32, #tpu.memory_space<vmem>>, %arg4: memref<1x1x8xf32, #tpu.memory_space<vmem>>, %arg5: memref<32x96xf32, #tpu.memory_space<vmem>>, %arg6: memref<1x96xf32, #tpu.memory_space<vmem>>, %arg7: memref<32x32xf32, #tpu.memory_space<vmem>>, %arg8: memref<1x32xf32, #tpu.memory_space<vmem>>, %arg9: memref<1x32xf32, #tpu.memory_space<vmem>>, %arg10: memref<1x32xf32, #tpu.memory_space<vmem>>, %arg11: memref<32x64xf32, #tpu.memory_space<vmem>>, %arg12: memref<1x64xf32, #tpu.memory_space<vmem>>, %arg13: memref<64x32xf32, #tpu.memory_space<vmem>>, %arg14: memref<1x32xf32, #tpu.memory_space<vmem>>, %arg15: memref<1x32xf32, #tpu.memory_space<vmem>>, %arg16: memref<1x32xf32, #tpu.memory_space<vmem>>, %arg17: memref<1x8x32xbf16, #tpu.memory_space<vmem>>) attributes {dimension_semantics = [#tpu.dimension_semantics<parallel>, #tpu.dimension_semantics<parallel>], iteration_bounds = array<i64: 2, 1>, scalar_prefetch = 0 : i64, scratch_operands = 0 : i64, tpu.core_type = #tpu.core_type<tc>, window_params = [{transform_indices = @transform_0, window_bounds = array<i64: 1, 8, 32>}, {transform_indices = @transform_1, window_bounds = array<i64: 1, 8, 32>}, {transform_indices = @transform_2, window_bounds = array<i64: 1, 1, 8>}, {pipeline_mode = #tpu.pipeline_mode<synchronous>, transform_indices = @transform_3, window_bounds = array<i64: 32, 96>}, {pipeline_mode = #tpu.pipeline_mode<synchronous>, transform_indices = @transform_4, window_bounds = array<i64: 1, 96>}, {pipeline_mode = #tpu.pipeline_mode<synchronous>, transform_indices = @transform_5, window_bounds = array<i64: 32, 32>}, {pipeline_mode = #tpu.pipeline_mode<synchronous>, transform_indices = @transform_6, window_bounds = array<i64: 1, 32>}, {pipeline_mode = #tpu.pipeline_mode<synchronous>, transform_indices = @transform_7, window_bounds = array<i64: 1, 32>}, {pipeline_mode = #tpu.pipeline_mode<synchronous>, transform_indices = @transform_8, window_bounds = array<i64: 1, 32>}, {pipeline_mode = #tpu.pipeline_mode<synchronous>, transform_indices = @transform_9, window_bounds = array<i64: 32, 64>}, {pipeline_mode = #tpu.pipeline_mode<synchronous>, transform_indices = @transform_10, window_bounds = array<i64: 1, 64>}, {pipeline_mode = #tpu.pipeline_mode<synchronous>, transform_indices = @transform_11, window_bounds = array<i64: 64, 32>}, {pipeline_mode = #tpu.pipeline_mode<synchronous>, transform_indices = @transform_12, window_bounds = array<i64: 1, 32>}, {pipeline_mode = #tpu.pipeline_mode<synchronous>, transform_indices = @transform_13, window_bounds = array<i64: 1, 32>}, {pipeline_mode = #tpu.pipeline_mode<synchronous>, transform_indices = @transform_14, window_bounds = array<i64: 1, 32>}, {transform_indices = @transform_15, window_bounds = array<i64: 1, 8, 32>}]} {
    %c0 = arith.constant 0 : index
    %c0_0 = arith.constant 0 : index
    %c0_1 = arith.constant 0 : index
    %0 = vector.load %arg2[%c0, %c0_0, %c0_1] : memref<1x8x32xf32, #tpu.memory_space<vmem>>, vector<1x8x32xf32>
    %1 = vector.shape_cast %0 : vector<1x8x32xf32> to vector<8x32xf32>
    %c0_2 = arith.constant 0 : index
    %c0_3 = arith.constant 0 : index
    %c0_4 = arith.constant 0 : index
    %2 = vector.load %arg3[%c0_2, %c0_3, %c0_4] : memref<1x8x32xf32, #tpu.memory_space<vmem>>, vector<1x8x32xf32>
    %3 = vector.shape_cast %2 : vector<1x8x32xf32> to vector<8x32xf32>
    %c0_5 = arith.constant 0 : index
    %c0_6 = arith.constant 0 : index
    %c0_7 = arith.constant 0 : index
    %4 = vector.load %arg4[%c0_5, %c0_6, %c0_7] : memref<1x1x8xf32, #tpu.memory_space<vmem>>, vector<1x1x8xf32>
    %5 = vector.shape_cast %4 : vector<1x1x8xf32> to vector<1x8xf32>
    %cst = arith.constant 0.000000e+00 : f32
    %6 = vector.broadcast %cst : f32 to vector<1x8xf32>
    %7 = arith.cmpf ogt, %5, %6 : vector<1x8xf32>
    %cst_8 = arith.constant 0.000000e+00 : f32
    %cst_9 = arith.constant -1.000000e+30 : f32
    %8 = vector.broadcast %cst_8 : f32 to vector<1x8xf32>
    %9 = vector.broadcast %cst_9 : f32 to vector<1x8xf32>
    %10 = arith.select %7, %8, %9 : vector<1x8xi1>, vector<1x8xf32>
    %c0_10 = arith.constant 0 : index
    %c0_11 = arith.constant 0 : index
    %11 = vector.load %arg5[%c0_10, %c0_11] : memref<32x96xf32, #tpu.memory_space<vmem>>, vector<32x96xf32>
    %12 = arith.truncf %11 : vector<32x96xf32> to vector<32x96xbf16>
    %13 = arith.truncf %1 : vector<8x32xf32> to vector<8x32xbf16>
    %14 = vector.extract_strided_slice %12 {offsets = [0, 0], sizes = [32, 32], strides = [1, 1]} : vector<32x96xbf16> to vector<32x32xbf16>
    %cst_12 = arith.constant dense<0.000000e+00> : vector<8x32xf32>
    %15 = tpu.matmul %13, %14, %cst_12 {dimension_numbers = #tpu.dot_dimension_numbers<[1], [0], [0], [1], [0, 0, 1, 1], [], []>} : vector<8x32xbf16>, vector<32x32xbf16>, vector<8x32xf32> -> vector<8x32xf32>
    %c0_13 = arith.constant 0 : index
    %c0_14 = arith.constant 0 : index
    %16 = vector.load %arg6[%c0_13, %c0_14] : memref<1x96xf32, #tpu.memory_space<vmem>>, vector<1x32xf32>
    %17 = vector.broadcast %16 : vector<1x32xf32> to vector<8x32xf32>
    %18 = arith.addf %15, %17 : vector<8x32xf32>
    %19 = arith.truncf %3 : vector<8x32xf32> to vector<8x32xbf16>
    %20 = vector.extract_strided_slice %12 {offsets = [0, 32], sizes = [32, 64], strides = [1, 1]} : vector<32x96xbf16> to vector<32x64xbf16>
    %cst_15 = arith.constant dense<0.000000e+00> : vector<8x64xf32>
    %21 = tpu.matmul %19, %20, %cst_15 {dimension_numbers = #tpu.dot_dimension_numbers<[1], [0], [0], [1], [0, 0, 1, 1], [], []>} : vector<8x32xbf16>, vector<32x64xbf16>, vector<8x64xf32> -> vector<8x64xf32>
    %c0_16 = arith.constant 0 : index
    %c32 = arith.constant 32 : index
    %22 = vector.load %arg6[%c0_16, %c32] : memref<1x96xf32, #tpu.memory_space<vmem>>, vector<1x64xf32>
    %23 = vector.broadcast %22 : vector<1x64xf32> to vector<8x64xf32>
    %24 = arith.addf %21, %23 : vector<8x64xf32>
    %25 = arith.truncf %18 : vector<8x32xf32> to vector<8x32xbf16>
    %26 = arith.truncf %24 : vector<8x64xf32> to vector<8x64xbf16>
    %27 = vector.extract_strided_slice %25 {offsets = [0, 0], sizes = [8, 8], strides = [1, 1]} : vector<8x32xbf16> to vector<8x8xbf16>
    %28 = vector.extract_strided_slice %26 {offsets = [0, 0], sizes = [8, 8], strides = [1, 1]} : vector<8x64xbf16> to vector<8x8xbf16>
    %29 = vector.extract_strided_slice %26 {offsets = [0, 32], sizes = [8, 8], strides = [1, 1]} : vector<8x64xbf16> to vector<8x8xbf16>
    %cst_17 = arith.constant dense<0.000000e+00> : vector<8x8xf32>
    %30 = tpu.matmul %27, %28, %cst_17 {dimension_numbers = #tpu.dot_dimension_numbers<[1], [1], [0], [0], [0, 0, 1, 0], [], []>} : vector<8x8xbf16>, vector<8x8xbf16>, vector<8x8xf32> -> vector<8x8xf32>
    %31 = vector.broadcast %10 : vector<1x8xf32> to vector<8x8xf32>
    %32 = arith.addf %30, %31 : vector<8x8xf32>
    %cst_18 = arith.constant dense<0xFF800000> : vector<8xf32>
    %33 = vector.multi_reduction <maximumf>, %32, %cst_18 [1] : vector<8x8xf32> to vector<8xf32>
    %34 = vector.shape_cast %33 : vector<8xf32> to vector<8x1xf32>
    %35 = vector.broadcast %34 : vector<8x1xf32> to vector<8x8xf32>
    %36 = arith.subf %32, %35 : vector<8x8xf32>
    %37 = math.exp %36 : vector<8x8xf32>
    %cst_19 = arith.constant dense<0.000000e+00> : vector<8xf32>
    %38 = vector.multi_reduction <add>, %37, %cst_19 [1] : vector<8x8xf32> to vector<8xf32>
    %39 = vector.shape_cast %38 : vector<8xf32> to vector<8x1xf32>
    %40 = tpu.reciprocal %39 {approx = true} : vector<8x1xf32> -> vector<8x1xf32>
    %41 = vector.broadcast %40 : vector<8x1xf32> to vector<8x8xf32>
    %42 = arith.mulf %37, %41 : vector<8x8xf32>
    %43 = arith.truncf %42 : vector<8x8xf32> to vector<8x8xbf16>
    %cst_20 = arith.constant dense<0.000000e+00> : vector<8x8xf32>
    %44 = tpu.matmul %43, %29, %cst_20 {dimension_numbers = #tpu.dot_dimension_numbers<[1], [0], [0], [1], [0, 0, 1, 1], [], []>} : vector<8x8xbf16>, vector<8x8xbf16>, vector<8x8xf32> -> vector<8x8xf32>
    %45 = vector.extract_strided_slice %25 {offsets = [0, 8], sizes = [8, 8], strides = [1, 1]} : vector<8x32xbf16> to vector<8x8xbf16>
    %46 = vector.extract_strided_slice %26 {offsets = [0, 8], sizes = [8, 8], strides = [1, 1]} : vector<8x64xbf16> to vector<8x8xbf16>
    %47 = vector.extract_strided_slice %26 {offsets = [0, 40], sizes = [8, 8], strides = [1, 1]} : vector<8x64xbf16> to vector<8x8xbf16>
    %cst_21 = arith.constant dense<0.000000e+00> : vector<8x8xf32>
    %48 = tpu.matmul %45, %46, %cst_21 {dimension_numbers = #tpu.dot_dimension_numbers<[1], [1], [0], [0], [0, 0, 1, 0], [], []>} : vector<8x8xbf16>, vector<8x8xbf16>, vector<8x8xf32> -> vector<8x8xf32>
    %49 = vector.broadcast %10 : vector<1x8xf32> to vector<8x8xf32>
    %50 = arith.addf %48, %49 : vector<8x8xf32>
    %cst_22 = arith.constant dense<0xFF800000> : vector<8xf32>
    %51 = vector.multi_reduction <maximumf>, %50, %cst_22 [1] : vector<8x8xf32> to vector<8xf32>
    %52 = vector.shape_cast %51 : vector<8xf32> to vector<8x1xf32>
    %53 = vector.broadcast %52 : vector<8x1xf32> to vector<8x8xf32>
    %54 = arith.subf %50, %53 : vector<8x8xf32>
    %55 = math.exp %54 : vector<8x8xf32>
    %cst_23 = arith.constant dense<0.000000e+00> : vector<8xf32>
    %56 = vector.multi_reduction <add>, %55, %cst_23 [1] : vector<8x8xf32> to vector<8xf32>
    %57 = vector.shape_cast %56 : vector<8xf32> to vector<8x1xf32>
    %58 = tpu.reciprocal %57 {approx = true} : vector<8x1xf32> -> vector<8x1xf32>
    %59 = vector.broadcast %58 : vector<8x1xf32> to vector<8x8xf32>
    %60 = arith.mulf %55, %59 : vector<8x8xf32>
    %61 = arith.truncf %60 : vector<8x8xf32> to vector<8x8xbf16>
    %cst_24 = arith.constant dense<0.000000e+00> : vector<8x8xf32>
    %62 = tpu.matmul %61, %47, %cst_24 {dimension_numbers = #tpu.dot_dimension_numbers<[1], [0], [0], [1], [0, 0, 1, 1], [], []>} : vector<8x8xbf16>, vector<8x8xbf16>, vector<8x8xf32> -> vector<8x8xf32>
    %63 = vector.extract_strided_slice %25 {offsets = [0, 16], sizes = [8, 8], strides = [1, 1]} : vector<8x32xbf16> to vector<8x8xbf16>
    %64 = vector.extract_strided_slice %26 {offsets = [0, 16], sizes = [8, 8], strides = [1, 1]} : vector<8x64xbf16> to vector<8x8xbf16>
    %65 = vector.extract_strided_slice %26 {offsets = [0, 48], sizes = [8, 8], strides = [1, 1]} : vector<8x64xbf16> to vector<8x8xbf16>
    %cst_25 = arith.constant dense<0.000000e+00> : vector<8x8xf32>
    %66 = tpu.matmul %63, %64, %cst_25 {dimension_numbers = #tpu.dot_dimension_numbers<[1], [1], [0], [0], [0, 0, 1, 0], [], []>} : vector<8x8xbf16>, vector<8x8xbf16>, vector<8x8xf32> -> vector<8x8xf32>
    %67 = vector.broadcast %10 : vector<1x8xf32> to vector<8x8xf32>
    %68 = arith.addf %66, %67 : vector<8x8xf32>
    %cst_26 = arith.constant dense<0xFF800000> : vector<8xf32>
    %69 = vector.multi_reduction <maximumf>, %68, %cst_26 [1] : vector<8x8xf32> to vector<8xf32>
    %70 = vector.shape_cast %69 : vector<8xf32> to vector<8x1xf32>
    %71 = vector.broadcast %70 : vector<8x1xf32> to vector<8x8xf32>
    %72 = arith.subf %68, %71 : vector<8x8xf32>
    %73 = math.exp %72 : vector<8x8xf32>
    %cst_27 = arith.constant dense<0.000000e+00> : vector<8xf32>
    %74 = vector.multi_reduction <add>, %73, %cst_27 [1] : vector<8x8xf32> to vector<8xf32>
    %75 = vector.shape_cast %74 : vector<8xf32> to vector<8x1xf32>
    %76 = tpu.reciprocal %75 {approx = true} : vector<8x1xf32> -> vector<8x1xf32>
    %77 = vector.broadcast %76 : vector<8x1xf32> to vector<8x8xf32>
    %78 = arith.mulf %73, %77 : vector<8x8xf32>
    %79 = arith.truncf %78 : vector<8x8xf32> to vector<8x8xbf16>
    %cst_28 = arith.constant dense<0.000000e+00> : vector<8x8xf32>
    %80 = tpu.matmul %79, %65, %cst_28 {dimension_numbers = #tpu.dot_dimension_numbers<[1], [0], [0], [1], [0, 0, 1, 1], [], []>} : vector<8x8xbf16>, vector<8x8xbf16>, vector<8x8xf32> -> vector<8x8xf32>
    %81 = vector.extract_strided_slice %25 {offsets = [0, 24], sizes = [8, 8], strides = [1, 1]} : vector<8x32xbf16> to vector<8x8xbf16>
    %82 = vector.extract_strided_slice %26 {offsets = [0, 24], sizes = [8, 8], strides = [1, 1]} : vector<8x64xbf16> to vector<8x8xbf16>
    %83 = vector.extract_strided_slice %26 {offsets = [0, 56], sizes = [8, 8], strides = [1, 1]} : vector<8x64xbf16> to vector<8x8xbf16>
    %cst_29 = arith.constant dense<0.000000e+00> : vector<8x8xf32>
    %84 = tpu.matmul %81, %82, %cst_29 {dimension_numbers = #tpu.dot_dimension_numbers<[1], [1], [0], [0], [0, 0, 1, 0], [], []>} : vector<8x8xbf16>, vector<8x8xbf16>, vector<8x8xf32> -> vector<8x8xf32>
    %85 = vector.broadcast %10 : vector<1x8xf32> to vector<8x8xf32>
    %86 = arith.addf %84, %85 : vector<8x8xf32>
    %cst_30 = arith.constant dense<0xFF800000> : vector<8xf32>
    %87 = vector.multi_reduction <maximumf>, %86, %cst_30 [1] : vector<8x8xf32> to vector<8xf32>
    %88 = vector.shape_cast %87 : vector<8xf32> to vector<8x1xf32>
    %89 = vector.broadcast %88 : vector<8x1xf32> to vector<8x8xf32>
    %90 = arith.subf %86, %89 : vector<8x8xf32>
    %91 = math.exp %90 : vector<8x8xf32>
    %cst_31 = arith.constant dense<0.000000e+00> : vector<8xf32>
    %92 = vector.multi_reduction <add>, %91, %cst_31 [1] : vector<8x8xf32> to vector<8xf32>
    %93 = vector.shape_cast %92 : vector<8xf32> to vector<8x1xf32>
    %94 = tpu.reciprocal %93 {approx = true} : vector<8x1xf32> -> vector<8x1xf32>
    %95 = vector.broadcast %94 : vector<8x1xf32> to vector<8x8xf32>
    %96 = arith.mulf %91, %95 : vector<8x8xf32>
    %97 = arith.truncf %96 : vector<8x8xf32> to vector<8x8xbf16>
    %cst_32 = arith.constant dense<0.000000e+00> : vector<8x8xf32>
    %98 = tpu.matmul %97, %83, %cst_32 {dimension_numbers = #tpu.dot_dimension_numbers<[1], [0], [0], [1], [0, 0, 1, 1], [], []>} : vector<8x8xbf16>, vector<8x8xbf16>, vector<8x8xf32> -> vector<8x8xf32>
    %99 = tpu.concatenate %44, %62, %80, %98 in 1 : vector<8x8xf32>, vector<8x8xf32>, vector<8x8xf32>, vector<8x8xf32> -> vector<8x32xf32>
    %100 = arith.truncf %99 : vector<8x32xf32> to vector<8x32xbf16>
    %c0_33 = arith.constant 0 : index
    %c0_34 = arith.constant 0 : index
    %101 = vector.load %arg7[%c0_33, %c0_34] : memref<32x32xf32, #tpu.memory_space<vmem>>, vector<32x32xf32>
    %102 = arith.truncf %101 : vector<32x32xf32> to vector<32x32xbf16>
    %cst_35 = arith.constant dense<0.000000e+00> : vector<8x32xf32>
    %103 = tpu.matmul %100, %102, %cst_35 {dimension_numbers = #tpu.dot_dimension_numbers<[1], [0], [0], [1], [0, 0, 1, 1], [], []>} : vector<8x32xbf16>, vector<32x32xbf16>, vector<8x32xf32> -> vector<8x32xf32>
    %104 = arith.addf %1, %103 : vector<8x32xf32>
    %c0_36 = arith.constant 0 : index
    %c0_37 = arith.constant 0 : index
    %105 = vector.load %arg8[%c0_36, %c0_37] : memref<1x32xf32, #tpu.memory_space<vmem>>, vector<1x32xf32>
    %106 = vector.broadcast %105 : vector<1x32xf32> to vector<8x32xf32>
    %107 = arith.addf %104, %106 : vector<8x32xf32>
    %c0_38 = arith.constant 0 : index
    %c0_39 = arith.constant 0 : index
    %108 = vector.load %arg9[%c0_38, %c0_39] : memref<1x32xf32, #tpu.memory_space<vmem>>, vector<1x32xf32>
    %c0_40 = arith.constant 0 : index
    %c0_41 = arith.constant 0 : index
    %109 = vector.load %arg10[%c0_40, %c0_41] : memref<1x32xf32, #tpu.memory_space<vmem>>, vector<1x32xf32>
    %cst_42 = arith.constant dense<0.000000e+00> : vector<8xf32>
    %110 = vector.multi_reduction <add>, %107, %cst_42 [1] : vector<8x32xf32> to vector<8xf32>
    %111 = vector.shape_cast %110 : vector<8xf32> to vector<8x1xf32>
    %cst_43 = arith.constant 3.200000e+01 : f32
    %112 = vector.broadcast %cst_43 : f32 to vector<8x1xf32>
    %113 = arith.divf %111, %112 : vector<8x1xf32>
    %114 = vector.broadcast %113 : vector<8x1xf32> to vector<8x32xf32>
    %115 = arith.subf %107, %114 : vector<8x32xf32>
    %116 = arith.mulf %115, %115 : vector<8x32xf32>
    %cst_44 = arith.constant dense<0.000000e+00> : vector<8xf32>
    %117 = vector.multi_reduction <add>, %116, %cst_44 [1] : vector<8x32xf32> to vector<8xf32>
    %118 = vector.shape_cast %117 : vector<8xf32> to vector<8x1xf32>
    %cst_45 = arith.constant 3.200000e+01 : f32
    %119 = vector.broadcast %cst_45 : f32 to vector<8x1xf32>
    %120 = arith.divf %118, %119 : vector<8x1xf32>
    %121 = vector.broadcast %113 : vector<8x1xf32> to vector<8x32xf32>
    %122 = arith.subf %107, %121 : vector<8x32xf32>
    %cst_46 = arith.constant 9.99999974E-6 : f32
    %123 = vector.broadcast %cst_46 : f32 to vector<8x1xf32>
    %124 = arith.addf %120, %123 : vector<8x1xf32>
    %125 = math.rsqrt %124 : vector<8x1xf32>
    %126 = vector.broadcast %125 : vector<8x1xf32> to vector<8x32xf32>
    %127 = arith.mulf %122, %126 : vector<8x32xf32>
    %128 = vector.broadcast %108 : vector<1x32xf32> to vector<8x32xf32>
    %129 = arith.mulf %127, %128 : vector<8x32xf32>
    %130 = vector.broadcast %109 : vector<1x32xf32> to vector<8x32xf32>
    %131 = arith.addf %129, %130 : vector<8x32xf32>
    %132 = arith.truncf %131 : vector<8x32xf32> to vector<8x32xbf16>
    %c0_47 = arith.constant 0 : index
    %c0_48 = arith.constant 0 : index
    %133 = vector.load %arg11[%c0_47, %c0_48] : memref<32x64xf32, #tpu.memory_space<vmem>>, vector<32x64xf32>
    %134 = arith.truncf %133 : vector<32x64xf32> to vector<32x64xbf16>
    %cst_49 = arith.constant dense<0.000000e+00> : vector<8x64xf32>
    %135 = tpu.matmul %132, %134, %cst_49 {dimension_numbers = #tpu.dot_dimension_numbers<[1], [0], [0], [1], [0, 0, 1, 1], [], []>} : vector<8x32xbf16>, vector<32x64xbf16>, vector<8x64xf32> -> vector<8x64xf32>
    %c0_50 = arith.constant 0 : index
    %c0_51 = arith.constant 0 : index
    %136 = vector.load %arg12[%c0_50, %c0_51] : memref<1x64xf32, #tpu.memory_space<vmem>>, vector<1x64xf32>
    %137 = vector.broadcast %136 : vector<1x64xf32> to vector<8x64xf32>
    %138 = arith.addf %135, %137 : vector<8x64xf32>
    %cst_52 = arith.constant 0.000000e+00 : f32
    %139 = vector.broadcast %cst_52 : f32 to vector<8x64xf32>
    %140 = arith.maximumf %138, %139 : vector<8x64xf32>
    %141 = arith.truncf %140 : vector<8x64xf32> to vector<8x64xbf16>
    %c0_53 = arith.constant 0 : index
    %c0_54 = arith.constant 0 : index
    %142 = vector.load %arg13[%c0_53, %c0_54] : memref<64x32xf32, #tpu.memory_space<vmem>>, vector<64x32xf32>
    %143 = arith.truncf %142 : vector<64x32xf32> to vector<64x32xbf16>
    %cst_55 = arith.constant dense<0.000000e+00> : vector<8x32xf32>
    %144 = tpu.matmul %141, %143, %cst_55 {dimension_numbers = #tpu.dot_dimension_numbers<[1], [0], [0], [1], [0, 0, 1, 1], [], []>} : vector<8x64xbf16>, vector<64x32xbf16>, vector<8x32xf32> -> vector<8x32xf32>
    %145 = arith.addf %131, %144 : vector<8x32xf32>
    %c0_56 = arith.constant 0 : index
    %c0_57 = arith.constant 0 : index
    %146 = vector.load %arg14[%c0_56, %c0_57] : memref<1x32xf32, #tpu.memory_space<vmem>>, vector<1x32xf32>
    %147 = vector.broadcast %146 : vector<1x32xf32> to vector<8x32xf32>
    %148 = arith.addf %145, %147 : vector<8x32xf32>
    %c0_58 = arith.constant 0 : index
    %c0_59 = arith.constant 0 : index
    %149 = vector.load %arg15[%c0_58, %c0_59] : memref<1x32xf32, #tpu.memory_space<vmem>>, vector<1x32xf32>
    %c0_60 = arith.constant 0 : index
    %c0_61 = arith.constant 0 : index
    %150 = vector.load %arg16[%c0_60, %c0_61] : memref<1x32xf32, #tpu.memory_space<vmem>>, vector<1x32xf32>
    %cst_62 = arith.constant dense<0.000000e+00> : vector<8xf32>
    %151 = vector.multi_reduction <add>, %148, %cst_62 [1] : vector<8x32xf32> to vector<8xf32>
    %152 = vector.shape_cast %151 : vector<8xf32> to vector<8x1xf32>
    %cst_63 = arith.constant 3.200000e+01 : f32
    %153 = vector.broadcast %cst_63 : f32 to vector<8x1xf32>
    %154 = arith.divf %152, %153 : vector<8x1xf32>
    %155 = vector.broadcast %154 : vector<8x1xf32> to vector<8x32xf32>
    %156 = arith.subf %148, %155 : vector<8x32xf32>
    %157 = arith.mulf %156, %156 : vector<8x32xf32>
    %cst_64 = arith.constant dense<0.000000e+00> : vector<8xf32>
    %158 = vector.multi_reduction <add>, %157, %cst_64 [1] : vector<8x32xf32> to vector<8xf32>
    %159 = vector.shape_cast %158 : vector<8xf32> to vector<8x1xf32>
    %cst_65 = arith.constant 3.200000e+01 : f32
    %160 = vector.broadcast %cst_65 : f32 to vector<8x1xf32>
    %161 = arith.divf %159, %160 : vector<8x1xf32>
    %162 = vector.broadcast %154 : vector<8x1xf32> to vector<8x32xf32>
    %163 = arith.subf %148, %162 : vector<8x32xf32>
    %cst_66 = arith.constant 9.99999974E-6 : f32
    %164 = vector.broadcast %cst_66 : f32 to vector<8x1xf32>
    %165 = arith.addf %161, %164 : vector<8x1xf32>
    %166 = math.rsqrt %165 : vector<8x1xf32>
    %167 = vector.broadcast %166 : vector<8x1xf32> to vector<8x32xf32>
    %168 = arith.mulf %163, %167 : vector<8x32xf32>
    %169 = vector.broadcast %149 : vector<1x32xf32> to vector<8x32xf32>
    %170 = arith.mulf %168, %169 : vector<8x32xf32>
    %171 = vector.broadcast %150 : vector<1x32xf32> to vector<8x32xf32>
    %172 = arith.addf %170, %171 : vector<8x32xf32>
    %173 = arith.truncf %172 : vector<8x32xf32> to vector<8x32xbf16>
    %c0_67 = arith.constant 0 : index
    %c0_68 = arith.constant 0 : index
    %c0_69 = arith.constant 0 : index
    %174 = vector.load %arg17[%c0_67, %c0_68, %c0_69] : memref<1x8x32xbf16, #tpu.memory_space<vmem>>, vector<1x8x32xbf16>
    %175 = vector.shape_cast %174 : vector<1x8x32xbf16> to vector<8x32xbf16>
    %176 = vector.shape_cast %173 : vector<8x32xbf16> to vector<1x8x32xbf16>
    tpu.vector_store %arg17[%c0_67, %c0_68, %c0_69], %176 {strides = array<i32>} : memref<1x8x32xbf16, #tpu.memory_space<vmem>>, vector<1x8x32xbf16>,
    return
  }
  func.func @transform_0(%arg0: i32, %arg1: i32) -> (i32, i32, i32) {
    %c0_i32 = arith.constant 0 : i32
    %c0_i32_0 = arith.constant 0 : i32
    return %arg0, %arg1, %c0_i32 : i32, i32, i32
  }
  func.func @transform_1(%arg0: i32, %arg1: i32) -> (i32, i32, i32) {
    %c0_i32 = arith.constant 0 : i32
    %c0_i32_0 = arith.constant 0 : i32
    %c0_i32_1 = arith.constant 0 : i32
    return %arg0, %c0_i32, %c0_i32_0 : i32, i32, i32
  }
  func.func @transform_2(%arg0: i32, %arg1: i32) -> (i32, i32, i32) {
    %c0_i32 = arith.constant 0 : i32
    %c0_i32_0 = arith.constant 0 : i32
    %c0_i32_1 = arith.constant 0 : i32
    return %arg0, %c0_i32, %c0_i32_0 : i32, i32, i32
  }
  func.func @transform_3(%arg0: i32, %arg1: i32) -> (i32, i32) {
    %c0_i32 = arith.constant 0 : i32
    %c0_i32_0 = arith.constant 0 : i32
    %c0_i32_1 = arith.constant 0 : i32
    return %c0_i32, %c0_i32_0 : i32, i32
  }
  func.func @transform_4(%arg0: i32, %arg1: i32) -> (i32, i32) {
    %c0_i32 = arith.constant 0 : i32
    %c0_i32_0 = arith.constant 0 : i32
    %c0_i32_1 = arith.constant 0 : i32
    return %c0_i32, %c0_i32_0 : i32, i32
  }
  func.func @transform_5(%arg0: i32, %arg1: i32) -> (i32, i32) {
    %c0_i32 = arith.constant 0 : i32
    %c0_i32_0 = arith.constant 0 : i32
    %c0_i32_1 = arith.constant 0 : i32
    return %c0_i32, %c0_i32_0 : i32, i32
  }
  func.func @transform_6(%arg0: i32, %arg1: i32) -> (i32, i32) {
    %c0_i32 = arith.constant 0 : i32
    %c0_i32_0 = arith.constant 0 : i32
    %c0_i32_1 = arith.constant 0 : i32
    return %c0_i32, %c0_i32_0 : i32, i32
  }
  func.func @transform_7(%arg0: i32, %arg1: i32) -> (i32, i32) {
    %c0_i32 = arith.constant 0 : i32
    %c0_i32_0 = arith.constant 0 : i32
    %c0_i32_1 = arith.constant 0 : i32
    return %c0_i32, %c0_i32_0 : i32, i32
  }
  func.func @transform_8(%arg0: i32, %arg1: i32) -> (i32, i32) {
    %c0_i32 = arith.constant 0 : i32
    %c0_i32_0 = arith.constant 0 : i32
    %c0_i32_1 = arith.constant 0 : i32
    return %c0_i32, %c0_i32_0 : i32, i32
  }
  func.func @transform_9(%arg0: i32, %arg1: i32) -> (i32, i32) {
    %c0_i32 = arith.constant 0 : i32
    %c0_i32_0 = arith.constant 0 : i32
    %c0_i32_1 = arith.constant 0 : i32
    return %c0_i32, %c0_i32_0 : i32, i32
  }
  func.func @transform_10(%arg0: i32, %arg1: i32) -> (i32, i32) {
    %c0_i32 = arith.constant 0 : i32
    %c0_i32_0 = arith.constant 0 : i32
    %c0_i32_1 = arith.constant 0 : i32
    return %c0_i32, %c0_i32_0 : i32, i32
  }
  func.func @transform_11(%arg0: i32, %arg1: i32) -> (i32, i32) {
    %c0_i32 = arith.constant 0 : i32
    %c0_i32_0 = arith.constant 0 : i32
    %c0_i32_1 = arith.constant 0 : i32
    return %c0_i32, %c0_i32_0 : i32, i32
  }
  func.func @transform_12(%arg0: i32, %arg1: i32) -> (i32, i32) {
    %c0_i32 = arith.constant 0 : i32
    %c0_i32_0 = arith.constant 0 : i32
    %c0_i32_1 = arith.constant 0 : i32
    return %c0_i32, %c0_i32_0 : i32, i32
  }
  func.func @transform_13(%arg0: i32, %arg1: i32) -> (i32, i32) {
    %c0_i32 = arith.constant 0 : i32
    %c0_i32_0 = arith.constant 0 : i32
    %c0_i32_1 = arith.constant 0 : i32
    return %c0_i32, %c0_i32_0 : i32, i32
  }
  func.func @transform_14(%arg0: i32, %arg1: i32) -> (i32, i32) {
    %c0_i32 = arith.constant 0 : i32
    %c0_i32_0 = arith.constant 0 : i32
    %c0_i32_1 = arith.constant 0 : i32
    return %c0_i32, %c0_i32_0 : i32, i32
  }
  func.func @transform_15(%arg0: i32, %arg1: i32) -> (i32, i32, i32) {
    %c0_i32 = arith.constant 0 : i32
    %c0_i32_0 = arith.constant 0 : i32
    return %arg0, %arg1, %c0_i32 : i32, i32, i32
  }
}

module attributes {stable_mosaic.version = 11 : i64} {
  func.func @_two_linear_kernel(%arg0: i32, %arg1: memref<16x32xf32, #tpu.memory_space<vmem>>, %arg2: memref<32x32xf32, #tpu.memory_space<vmem>>, %arg3: memref<1x32xf32, #tpu.memory_space<vmem>>, %arg4: memref<32x256xf32, #tpu.memory_space<vmem>>, %arg5: memref<1x256xf32, #tpu.memory_space<vmem>>, %arg6: memref<16x256xbf16, #tpu.memory_space<vmem>>) attributes {dimension_semantics = [#tpu.dimension_semantics<parallel>], iteration_bounds = array<i64: 1>, scalar_prefetch = 0 : i64, scratch_operands = 0 : i64, tpu.core_type = #tpu.core_type<tc>, window_params = [{transform_indices = @transform_0, window_bounds = array<i64: 16, 32>}, {pipeline_mode = #tpu.pipeline_mode<synchronous>, transform_indices = @transform_1, window_bounds = array<i64: 32, 32>}, {pipeline_mode = #tpu.pipeline_mode<synchronous>, transform_indices = @transform_2, window_bounds = array<i64: 1, 32>}, {pipeline_mode = #tpu.pipeline_mode<synchronous>, transform_indices = @transform_3, window_bounds = array<i64: 32, 256>}, {pipeline_mode = #tpu.pipeline_mode<synchronous>, transform_indices = @transform_4, window_bounds = array<i64: 1, 256>}, {transform_indices = @transform_5, window_bounds = array<i64: 16, 256>}]} {
    %c0 = arith.constant 0 : index
    %c0_0 = arith.constant 0 : index
    %0 = vector.load %arg1[%c0, %c0_0] : memref<16x32xf32, #tpu.memory_space<vmem>>, vector<16x32xf32>
    %1 = arith.truncf %0 : vector<16x32xf32> to vector<16x32xbf16>
    %c0_1 = arith.constant 0 : index
    %c0_2 = arith.constant 0 : index
    %2 = vector.load %arg2[%c0_1, %c0_2] : memref<32x32xf32, #tpu.memory_space<vmem>>, vector<32x32xf32>
    %3 = arith.truncf %2 : vector<32x32xf32> to vector<32x32xbf16>
    %cst = arith.constant dense<0.000000e+00> : vector<16x32xf32>
    %4 = tpu.matmul %1, %3, %cst {dimension_numbers = #tpu.dot_dimension_numbers<[1], [0], [0], [1], [0, 0, 1, 1], [], []>} : vector<16x32xbf16>, vector<32x32xbf16>, vector<16x32xf32> -> vector<16x32xf32>
    %c0_3 = arith.constant 0 : index
    %c0_4 = arith.constant 0 : index
    %5 = vector.load %arg3[%c0_3, %c0_4] : memref<1x32xf32, #tpu.memory_space<vmem>>, vector<1x32xf32>
    %6 = vector.broadcast %5 : vector<1x32xf32> to vector<16x32xf32>
    %7 = arith.addf %4, %6 : vector<16x32xf32>
    %8 = arith.truncf %7 : vector<16x32xf32> to vector<16x32xbf16>
    %c0_5 = arith.constant 0 : index
    %c0_6 = arith.constant 0 : index
    %9 = vector.load %arg4[%c0_5, %c0_6] : memref<32x256xf32, #tpu.memory_space<vmem>>, vector<32x256xf32>
    %10 = arith.truncf %9 : vector<32x256xf32> to vector<32x256xbf16>
    %cst_7 = arith.constant dense<0.000000e+00> : vector<16x256xf32>
    %11 = tpu.matmul %8, %10, %cst_7 {dimension_numbers = #tpu.dot_dimension_numbers<[1], [0], [0], [1], [0, 0, 1, 1], [], []>} : vector<16x32xbf16>, vector<32x256xbf16>, vector<16x256xf32> -> vector<16x256xf32>
    %c0_8 = arith.constant 0 : index
    %c0_9 = arith.constant 0 : index
    %12 = vector.load %arg5[%c0_8, %c0_9] : memref<1x256xf32, #tpu.memory_space<vmem>>, vector<1x256xf32>
    %13 = vector.broadcast %12 : vector<1x256xf32> to vector<16x256xf32>
    %14 = arith.addf %11, %13 : vector<16x256xf32>
    %15 = arith.truncf %14 : vector<16x256xf32> to vector<16x256xbf16>
    %c0_10 = arith.constant 0 : index
    %c0_11 = arith.constant 0 : index
    %16 = vector.load %arg6[%c0_10, %c0_11] : memref<16x256xbf16, #tpu.memory_space<vmem>>, vector<16x256xbf16>
    tpu.vector_store %arg6[%c0_10, %c0_11], %15 {strides = array<i32>} : memref<16x256xbf16, #tpu.memory_space<vmem>>, vector<16x256xbf16>,
    return
  }
  func.func @transform_0(%arg0: i32) -> (i32, i32) {
    %c0_i32 = arith.constant 0 : i32
    %c0_i32_0 = arith.constant 0 : i32
    return %arg0, %c0_i32 : i32, i32
  }
  func.func @transform_1(%arg0: i32) -> (i32, i32) {
    %c0_i32 = arith.constant 0 : i32
    %c0_i32_0 = arith.constant 0 : i32
    %c0_i32_1 = arith.constant 0 : i32
    return %c0_i32, %c0_i32_0 : i32, i32
  }
  func.func @transform_2(%arg0: i32) -> (i32, i32) {
    %c0_i32 = arith.constant 0 : i32
    %c0_i32_0 = arith.constant 0 : i32
    %c0_i32_1 = arith.constant 0 : i32
    return %c0_i32, %c0_i32_0 : i32, i32
  }
  func.func @transform_3(%arg0: i32) -> (i32, i32) {
    %c0_i32 = arith.constant 0 : i32
    %c0_i32_0 = arith.constant 0 : i32
    %c0_i32_1 = arith.constant 0 : i32
    return %c0_i32, %c0_i32_0 : i32, i32
  }
  func.func @transform_4(%arg0: i32) -> (i32, i32) {
    %c0_i32 = arith.constant 0 : i32
    %c0_i32_0 = arith.constant 0 : i32
    %c0_i32_1 = arith.constant 0 : i32
    return %c0_i32, %c0_i32_0 : i32, i32
  }
  func.func @transform_5(%arg0: i32) -> (i32, i32) {
    %c0_i32 = arith.constant 0 : i32
    %c0_i32_0 = arith.constant 0 : i32
    return %arg0, %c0_i32 : i32, i32
  }
}

module attributes {stable_mosaic.version = 11 : i64} {
  func.func @_informer_kernel(%arg0: i32, %arg1: memref<1x8x32xbf16, #tpu.memory_space<vmem>>, %arg2: memref<1x8x256xbf16, #tpu.memory_space<vmem>>, %arg3: memref<1x8x8x128xbf16, #tpu.memory_space<vmem>>, %arg4: memref<1x8x1xf32, #tpu.memory_space<vmem>>, %arg5: memref<1x1x8xf32, #tpu.memory_space<vmem>>, %arg6: memref<128x32xf32, #tpu.memory_space<vmem>>, %arg7: memref<1x32xf32, #tpu.memory_space<vmem>>, %arg8: memref<32x4xf32, #tpu.memory_space<vmem>>, %arg9: memref<1x4xf32, #tpu.memory_space<vmem>>, %arg10: memref<1x8x128xbf16, #tpu.memory_space<vmem>>) attributes {dimension_semantics = [#tpu.dimension_semantics<parallel>], iteration_bounds = array<i64: 2>, scalar_prefetch = 0 : i64, scratch_operands = 0 : i64, tpu.core_type = #tpu.core_type<tc>, window_params = [{transform_indices = @transform_0, window_bounds = array<i64: 1, 8, 32>}, {transform_indices = @transform_1, window_bounds = array<i64: 1, 8, 256>}, {transform_indices = @transform_2, window_bounds = array<i64: 1, 8, 8, 128>}, {transform_indices = @transform_3, window_bounds = array<i64: 1, 8, 1>}, {transform_indices = @transform_4, window_bounds = array<i64: 1, 1, 8>}, {pipeline_mode = #tpu.pipeline_mode<synchronous>, transform_indices = @transform_5, window_bounds = array<i64: 128, 32>}, {pipeline_mode = #tpu.pipeline_mode<synchronous>, transform_indices = @transform_6, window_bounds = array<i64: 1, 32>}, {pipeline_mode = #tpu.pipeline_mode<synchronous>, transform_indices = @transform_7, window_bounds = array<i64: 32, 4>}, {pipeline_mode = #tpu.pipeline_mode<synchronous>, transform_indices = @transform_8, window_bounds = array<i64: 1, 4>}, {transform_indices = @transform_9, window_bounds = array<i64: 1, 8, 128>}]} {
    %c0 = arith.constant 0 : index
    %c0_0 = arith.constant 0 : index
    %c0_1 = arith.constant 0 : index
    %0 = vector.load %arg1[%c0, %c0_0, %c0_1] : memref<1x8x32xbf16, #tpu.memory_space<vmem>>, vector<1x8x32xbf16>
    %1 = vector.shape_cast %0 : vector<1x8x32xbf16> to vector<8x32xbf16>
    %c0_2 = arith.constant 0 : index
    %c0_3 = arith.constant 0 : index
    %c0_4 = arith.constant 0 : index
    %2 = vector.load %arg2[%c0_2, %c0_3, %c0_4] : memref<1x8x256xbf16, #tpu.memory_space<vmem>>, vector<1x8x256xbf16>
    %3 = vector.shape_cast %2 : vector<1x8x256xbf16> to vector<8x256xbf16>
    %c0_5 = arith.constant 0 : index
    %c0_6 = arith.constant 0 : index
    %c0_7 = arith.constant 0 : index
    %4 = vector.load %arg4[%c0_5, %c0_6, %c0_7] : memref<1x8x1xf32, #tpu.memory_space<vmem>>, vector<1x8x1xf32>
    %5 = vector.shape_cast %4 : vector<1x8x1xf32> to vector<8x1xf32>
    %cst = arith.constant 0.000000e+00 : f32
    %6 = vector.broadcast %cst : f32 to vector<8x1xf32>
    %7 = arith.cmpf ogt, %5, %6 : vector<8x1xf32>
    %cst_8 = arith.constant 0.000000e+00 : f32
    %cst_9 = arith.constant -1.000000e+30 : f32
    %8 = vector.broadcast %cst_8 : f32 to vector<8x1xf32>
    %9 = vector.broadcast %cst_9 : f32 to vector<8x1xf32>
    %10 = arith.select %7, %8, %9 : vector<8x1xi1>, vector<8x1xf32>
    %c0_10 = arith.constant 0 : index
    %c0_11 = arith.constant 0 : index
    %c0_12 = arith.constant 0 : index
    %11 = vector.load %arg5[%c0_10, %c0_11, %c0_12] : memref<1x1x8xf32, #tpu.memory_space<vmem>>, vector<1x1x8xf32>
    %12 = vector.shape_cast %11 : vector<1x1x8xf32> to vector<1x8xf32>
    %c0_13 = arith.constant 0 : index
    %c0_14 = arith.constant 0 : index
    %c0_15 = arith.constant 0 : index
    %c0_16 = arith.constant 0 : index
    %13 = vector.load %arg3[%c0_13, %c0_14, %c0_15, %c0_16] : memref<1x8x8x128xbf16, #tpu.memory_space<vmem>>, vector<1x8x8x128xbf16>
    %14 = vector.shape_cast %13 : vector<1x8x8x128xbf16> to vector<8x8x128xbf16>
    %15 = vector.shape_cast %14 : vector<8x8x128xbf16> to vector<64x128xbf16>
    %c0_17 = arith.constant 0 : index
    %c0_18 = arith.constant 0 : index
    %16 = vector.load %arg6[%c0_17, %c0_18] : memref<128x32xf32, #tpu.memory_space<vmem>>, vector<128x32xf32>
    %17 = arith.truncf %16 : vector<128x32xf32> to vector<128x32xbf16>
    %cst_19 = arith.constant dense<0.000000e+00> : vector<64x32xf32>
    %18 = tpu.matmul %15, %17, %cst_19 {dimension_numbers = #tpu.dot_dimension_numbers<[1], [0], [0], [1], [0, 0, 1, 1], [], []>} : vector<64x128xbf16>, vector<128x32xbf16>, vector<64x32xf32> -> vector<64x32xf32>
    %c0_20 = arith.constant 0 : index
    %c0_21 = arith.constant 0 : index
    %19 = vector.load %arg7[%c0_20, %c0_21] : memref<1x32xf32, #tpu.memory_space<vmem>>, vector<1x32xf32>
    %20 = vector.broadcast %19 : vector<1x32xf32> to vector<64x32xf32>
    %21 = arith.addf %18, %20 : vector<64x32xf32>
    %cst_22 = arith.constant 0.000000e+00 : f32
    %22 = vector.broadcast %cst_22 : f32 to vector<64x32xf32>
    %23 = arith.maximumf %21, %22 : vector<64x32xf32>
    %24 = arith.truncf %23 : vector<64x32xf32> to vector<64x32xbf16>
    %c0_23 = arith.constant 0 : index
    %c0_24 = arith.constant 0 : index
    %25 = vector.load %arg8[%c0_23, %c0_24] : memref<32x4xf32, #tpu.memory_space<vmem>>, vector<32x4xf32>
    %26 = arith.truncf %25 : vector<32x4xf32> to vector<32x4xbf16>
    %cst_25 = arith.constant dense<0.000000e+00> : vector<64x4xf32>
    %27 = tpu.matmul %24, %26, %cst_25 {dimension_numbers = #tpu.dot_dimension_numbers<[1], [0], [0], [1], [0, 0, 1, 1], [], []>} : vector<64x32xbf16>, vector<32x4xbf16>, vector<64x4xf32> -> vector<64x4xf32>
    %c0_26 = arith.constant 0 : index
    %c0_27 = arith.constant 0 : index
    %28 = vector.load %arg9[%c0_26, %c0_27] : memref<1x4xf32, #tpu.memory_space<vmem>>, vector<1x4xf32>
    %29 = vector.broadcast %28 : vector<1x4xf32> to vector<64x4xf32>
    %30 = arith.addf %27, %29 : vector<64x4xf32>
    %31 = vector.shape_cast %30 : vector<64x4xf32> to vector<8x8x4xf32>
    %32 = vector.extract_strided_slice %3 {offsets = [0, 0], sizes = [8, 32], strides = [1, 1]} : vector<8x256xbf16> to vector<8x32xbf16>
    %33 = vector.extract_strided_slice %3 {offsets = [0, 128], sizes = [8, 32], strides = [1, 1]} : vector<8x256xbf16> to vector<8x32xbf16>
    %cst_28 = arith.constant dense<0.000000e+00> : vector<8x8xf32>
    %34 = tpu.matmul %1, %32, %cst_28 {dimension_numbers = #tpu.dot_dimension_numbers<[1], [1], [0], [0], [0, 0, 1, 0], [], []>} : vector<8x32xbf16>, vector<8x32xbf16>, vector<8x8xf32> -> vector<8x8xf32>
    %35 = vector.extract_strided_slice %31 {offsets = [0, 0, 0], sizes = [8, 8, 1], strides = [1, 1, 1]} : vector<8x8x4xf32> to vector<8x8x1xf32>
    %36 = vector.shape_cast %35 : vector<8x8x1xf32> to vector<8x8xf32>
    %37 = arith.addf %34, %36 : vector<8x8xf32>
    %38 = vector.broadcast %10 : vector<8x1xf32> to vector<8x8xf32>
    %39 = arith.addf %37, %38 : vector<8x8xf32>
    %cst_29 = arith.constant dense<0xFF800000> : vector<8xf32>
    %40 = vector.multi_reduction <maximumf>, %39, %cst_29 [0] : vector<8x8xf32> to vector<8xf32>
    %41 = vector.shape_cast %40 : vector<8xf32> to vector<1x8xf32>
    %42 = vector.broadcast %41 : vector<1x8xf32> to vector<8x8xf32>
    %43 = arith.subf %39, %42 : vector<8x8xf32>
    %44 = math.exp %43 : vector<8x8xf32>
    %cst_30 = arith.constant dense<0.000000e+00> : vector<8xf32>
    %45 = vector.multi_reduction <add>, %44, %cst_30 [0] : vector<8x8xf32> to vector<8xf32>
    %46 = vector.shape_cast %45 : vector<8xf32> to vector<1x8xf32>
    %47 = tpu.reciprocal %46 {approx = true} : vector<1x8xf32> -> vector<1x8xf32>
    %48 = vector.broadcast %47 : vector<1x8xf32> to vector<8x8xf32>
    %49 = arith.mulf %44, %48 : vector<8x8xf32>
    %50 = vector.broadcast %12 : vector<1x8xf32> to vector<8x8xf32>
    %51 = arith.mulf %49, %50 : vector<8x8xf32>
    %52 = arith.truncf %51 : vector<8x8xf32> to vector<8x8xbf16>
    %cst_31 = arith.constant dense<0.000000e+00> : vector<8x32xf32>
    %53 = tpu.matmul %52, %33, %cst_31 {dimension_numbers = #tpu.dot_dimension_numbers<[1], [0], [0], [1], [0, 0, 1, 1], [], []>} : vector<8x8xbf16>, vector<8x32xbf16>, vector<8x32xf32> -> vector<8x32xf32>
    %54 = vector.extract_strided_slice %3 {offsets = [0, 32], sizes = [8, 32], strides = [1, 1]} : vector<8x256xbf16> to vector<8x32xbf16>
    %55 = vector.extract_strided_slice %3 {offsets = [0, 160], sizes = [8, 32], strides = [1, 1]} : vector<8x256xbf16> to vector<8x32xbf16>
    %cst_32 = arith.constant dense<0.000000e+00> : vector<8x8xf32>
    %56 = tpu.matmul %1, %54, %cst_32 {dimension_numbers = #tpu.dot_dimension_numbers<[1], [1], [0], [0], [0, 0, 1, 0], [], []>} : vector<8x32xbf16>, vector<8x32xbf16>, vector<8x8xf32> -> vector<8x8xf32>
    %57 = vector.extract_strided_slice %31 {offsets = [0, 0, 1], sizes = [8, 8, 1], strides = [1, 1, 1]} : vector<8x8x4xf32> to vector<8x8x1xf32>
    %58 = vector.shape_cast %57 : vector<8x8x1xf32> to vector<8x8xf32>
    %59 = arith.addf %56, %58 : vector<8x8xf32>
    %60 = vector.broadcast %10 : vector<8x1xf32> to vector<8x8xf32>
    %61 = arith.addf %59, %60 : vector<8x8xf32>
    %cst_33 = arith.constant dense<0xFF800000> : vector<8xf32>
    %62 = vector.multi_reduction <maximumf>, %61, %cst_33 [0] : vector<8x8xf32> to vector<8xf32>
    %63 = vector.shape_cast %62 : vector<8xf32> to vector<1x8xf32>
    %64 = vector.broadcast %63 : vector<1x8xf32> to vector<8x8xf32>
    %65 = arith.subf %61, %64 : vector<8x8xf32>
    %66 = math.exp %65 : vector<8x8xf32>
    %cst_34 = arith.constant dense<0.000000e+00> : vector<8xf32>
    %67 = vector.multi_reduction <add>, %66, %cst_34 [0] : vector<8x8xf32> to vector<8xf32>
    %68 = vector.shape_cast %67 : vector<8xf32> to vector<1x8xf32>
    %69 = tpu.reciprocal %68 {approx = true} : vector<1x8xf32> -> vector<1x8xf32>
    %70 = vector.broadcast %69 : vector<1x8xf32> to vector<8x8xf32>
    %71 = arith.mulf %66, %70 : vector<8x8xf32>
    %72 = vector.broadcast %12 : vector<1x8xf32> to vector<8x8xf32>
    %73 = arith.mulf %71, %72 : vector<8x8xf32>
    %74 = arith.truncf %73 : vector<8x8xf32> to vector<8x8xbf16>
    %cst_35 = arith.constant dense<0.000000e+00> : vector<8x32xf32>
    %75 = tpu.matmul %74, %55, %cst_35 {dimension_numbers = #tpu.dot_dimension_numbers<[1], [0], [0], [1], [0, 0, 1, 1], [], []>} : vector<8x8xbf16>, vector<8x32xbf16>, vector<8x32xf32> -> vector<8x32xf32>
    %76 = vector.extract_strided_slice %3 {offsets = [0, 64], sizes = [8, 32], strides = [1, 1]} : vector<8x256xbf16> to vector<8x32xbf16>
    %77 = vector.extract_strided_slice %3 {offsets = [0, 192], sizes = [8, 32], strides = [1, 1]} : vector<8x256xbf16> to vector<8x32xbf16>
    %cst_36 = arith.constant dense<0.000000e+00> : vector<8x8xf32>
    %78 = tpu.matmul %1, %76, %cst_36 {dimension_numbers = #tpu.dot_dimension_numbers<[1], [1], [0], [0], [0, 0, 1, 0], [], []>} : vector<8x32xbf16>, vector<8x32xbf16>, vector<8x8xf32> -> vector<8x8xf32>
    %79 = vector.extract_strided_slice %31 {offsets = [0, 0, 2], sizes = [8, 8, 1], strides = [1, 1, 1]} : vector<8x8x4xf32> to vector<8x8x1xf32>
    %80 = vector.shape_cast %79 : vector<8x8x1xf32> to vector<8x8xf32>
    %81 = arith.addf %78, %80 : vector<8x8xf32>
    %82 = vector.broadcast %10 : vector<8x1xf32> to vector<8x8xf32>
    %83 = arith.addf %81, %82 : vector<8x8xf32>
    %cst_37 = arith.constant dense<0xFF800000> : vector<8xf32>
    %84 = vector.multi_reduction <maximumf>, %83, %cst_37 [0] : vector<8x8xf32> to vector<8xf32>
    %85 = vector.shape_cast %84 : vector<8xf32> to vector<1x8xf32>
    %86 = vector.broadcast %85 : vector<1x8xf32> to vector<8x8xf32>
    %87 = arith.subf %83, %86 : vector<8x8xf32>
    %88 = math.exp %87 : vector<8x8xf32>
    %cst_38 = arith.constant dense<0.000000e+00> : vector<8xf32>
    %89 = vector.multi_reduction <add>, %88, %cst_38 [0] : vector<8x8xf32> to vector<8xf32>
    %90 = vector.shape_cast %89 : vector<8xf32> to vector<1x8xf32>
    %91 = tpu.reciprocal %90 {approx = true} : vector<1x8xf32> -> vector<1x8xf32>
    %92 = vector.broadcast %91 : vector<1x8xf32> to vector<8x8xf32>
    %93 = arith.mulf %88, %92 : vector<8x8xf32>
    %94 = vector.broadcast %12 : vector<1x8xf32> to vector<8x8xf32>
    %95 = arith.mulf %93, %94 : vector<8x8xf32>
    %96 = arith.truncf %95 : vector<8x8xf32> to vector<8x8xbf16>
    %cst_39 = arith.constant dense<0.000000e+00> : vector<8x32xf32>
    %97 = tpu.matmul %96, %77, %cst_39 {dimension_numbers = #tpu.dot_dimension_numbers<[1], [0], [0], [1], [0, 0, 1, 1], [], []>} : vector<8x8xbf16>, vector<8x32xbf16>, vector<8x32xf32> -> vector<8x32xf32>
    %98 = vector.extract_strided_slice %3 {offsets = [0, 96], sizes = [8, 32], strides = [1, 1]} : vector<8x256xbf16> to vector<8x32xbf16>
    %99 = vector.extract_strided_slice %3 {offsets = [0, 224], sizes = [8, 32], strides = [1, 1]} : vector<8x256xbf16> to vector<8x32xbf16>
    %cst_40 = arith.constant dense<0.000000e+00> : vector<8x8xf32>
    %100 = tpu.matmul %1, %98, %cst_40 {dimension_numbers = #tpu.dot_dimension_numbers<[1], [1], [0], [0], [0, 0, 1, 0], [], []>} : vector<8x32xbf16>, vector<8x32xbf16>, vector<8x8xf32> -> vector<8x8xf32>
    %101 = vector.extract_strided_slice %31 {offsets = [0, 0, 3], sizes = [8, 8, 1], strides = [1, 1, 1]} : vector<8x8x4xf32> to vector<8x8x1xf32>
    %102 = vector.shape_cast %101 : vector<8x8x1xf32> to vector<8x8xf32>
    %103 = arith.addf %100, %102 : vector<8x8xf32>
    %104 = vector.broadcast %10 : vector<8x1xf32> to vector<8x8xf32>
    %105 = arith.addf %103, %104 : vector<8x8xf32>
    %cst_41 = arith.constant dense<0xFF800000> : vector<8xf32>
    %106 = vector.multi_reduction <maximumf>, %105, %cst_41 [0] : vector<8x8xf32> to vector<8xf32>
    %107 = vector.shape_cast %106 : vector<8xf32> to vector<1x8xf32>
    %108 = vector.broadcast %107 : vector<1x8xf32> to vector<8x8xf32>
    %109 = arith.subf %105, %108 : vector<8x8xf32>
    %110 = math.exp %109 : vector<8x8xf32>
    %cst_42 = arith.constant dense<0.000000e+00> : vector<8xf32>
    %111 = vector.multi_reduction <add>, %110, %cst_42 [0] : vector<8x8xf32> to vector<8xf32>
    %112 = vector.shape_cast %111 : vector<8xf32> to vector<1x8xf32>
    %113 = tpu.reciprocal %112 {approx = true} : vector<1x8xf32> -> vector<1x8xf32>
    %114 = vector.broadcast %113 : vector<1x8xf32> to vector<8x8xf32>
    %115 = arith.mulf %110, %114 : vector<8x8xf32>
    %116 = vector.broadcast %12 : vector<1x8xf32> to vector<8x8xf32>
    %117 = arith.mulf %115, %116 : vector<8x8xf32>
    %118 = arith.truncf %117 : vector<8x8xf32> to vector<8x8xbf16>
    %cst_43 = arith.constant dense<0.000000e+00> : vector<8x32xf32>
    %119 = tpu.matmul %118, %99, %cst_43 {dimension_numbers = #tpu.dot_dimension_numbers<[1], [0], [0], [1], [0, 0, 1, 1], [], []>} : vector<8x8xbf16>, vector<8x32xbf16>, vector<8x32xf32> -> vector<8x32xf32>
    %120 = tpu.concatenate %53, %75, %97, %119 in 1 : vector<8x32xf32>, vector<8x32xf32>, vector<8x32xf32>, vector<8x32xf32> -> vector<8x128xf32>
    %121 = arith.truncf %120 : vector<8x128xf32> to vector<8x128xbf16>
    %c0_44 = arith.constant 0 : index
    %c0_45 = arith.constant 0 : index
    %c0_46 = arith.constant 0 : index
    %122 = vector.load %arg10[%c0_44, %c0_45, %c0_46] : memref<1x8x128xbf16, #tpu.memory_space<vmem>>, vector<1x8x128xbf16>
    %123 = vector.shape_cast %122 : vector<1x8x128xbf16> to vector<8x128xbf16>
    %124 = vector.shape_cast %121 : vector<8x128xbf16> to vector<1x8x128xbf16>
    tpu.vector_store %arg10[%c0_44, %c0_45, %c0_46], %124 {strides = array<i32>} : memref<1x8x128xbf16, #tpu.memory_space<vmem>>, vector<1x8x128xbf16>,
    return
  }
  func.func @transform_0(%arg0: i32) -> (i32, i32, i32) {
    %c0_i32 = arith.constant 0 : i32
    %c0_i32_0 = arith.constant 0 : i32
    %c0_i32_1 = arith.constant 0 : i32
    return %arg0, %c0_i32, %c0_i32_0 : i32, i32, i32
  }
  func.func @transform_1(%arg0: i32) -> (i32, i32, i32) {
    %c0_i32 = arith.constant 0 : i32
    %c0_i32_0 = arith.constant 0 : i32
    %c0_i32_1 = arith.constant 0 : i32
    return %arg0, %c0_i32, %c0_i32_0 : i32, i32, i32
  }
  func.func @transform_2(%arg0: i32) -> (i32, i32, i32, i32) {
    %c0_i32 = arith.constant 0 : i32
    %c0_i32_0 = arith.constant 0 : i32
    %c0_i32_1 = arith.constant 0 : i32
    %c0_i32_2 = arith.constant 0 : i32
    return %arg0, %c0_i32, %c0_i32_0, %c0_i32_1 : i32, i32, i32, i32
  }
  func.func @transform_3(%arg0: i32) -> (i32, i32, i32) {
    %c0_i32 = arith.constant 0 : i32
    %c0_i32_0 = arith.constant 0 : i32
    %c0_i32_1 = arith.constant 0 : i32
    return %arg0, %c0_i32, %c0_i32_0 : i32, i32, i32
  }
  func.func @transform_4(%arg0: i32) -> (i32, i32, i32) {
    %c0_i32 = arith.constant 0 : i32
    %c0_i32_0 = arith.constant 0 : i32
    %c0_i32_1 = arith.constant 0 : i32
    return %arg0, %c0_i32, %c0_i32_0 : i32, i32, i32
  }
  func.func @transform_5(%arg0: i32) -> (i32, i32) {
    %c0_i32 = arith.constant 0 : i32
    %c0_i32_0 = arith.constant 0 : i32
    %c0_i32_1 = arith.constant 0 : i32
    return %c0_i32, %c0_i32_0 : i32, i32
  }
  func.func @transform_6(%arg0: i32) -> (i32, i32) {
    %c0_i32 = arith.constant 0 : i32
    %c0_i32_0 = arith.constant 0 : i32
    %c0_i32_1 = arith.constant 0 : i32
    return %c0_i32, %c0_i32_0 : i32, i32
  }
  func.func @transform_7(%arg0: i32) -> (i32, i32) {
    %c0_i32 = arith.constant 0 : i32
    %c0_i32_0 = arith.constant 0 : i32
    %c0_i32_1 = arith.constant 0 : i32
    return %c0_i32, %c0_i32_0 : i32, i32
  }
  func.func @transform_8(%arg0: i32) -> (i32, i32) {
    %c0_i32 = arith.constant 0 : i32
    %c0_i32_0 = arith.constant 0 : i32
    %c0_i32_1 = arith.constant 0 : i32
    return %c0_i32, %c0_i32_0 : i32, i32
  }
  func.func @transform_9(%arg0: i32) -> (i32, i32, i32) {
    %c0_i32 = arith.constant 0 : i32
    %c0_i32_0 = arith.constant 0 : i32
    %c0_i32_1 = arith.constant 0 : i32
    return %arg0, %c0_i32, %c0_i32_0 : i32, i32, i32
  }
}

module attributes {stable_mosaic.version = 11 : i64} {
  func.func @_linear_logsoftmax_kernel(%arg0: i32, %arg1: memref<16x128xbf16, #tpu.memory_space<vmem>>, %arg2: memref<128x128xf32, #tpu.memory_space<vmem>>, %arg3: memref<1x128xf32, #tpu.memory_space<vmem>>, %arg4: memref<16x128xf32, #tpu.memory_space<vmem>>) attributes {dimension_semantics = [#tpu.dimension_semantics<parallel>], iteration_bounds = array<i64: 1>, scalar_prefetch = 0 : i64, scratch_operands = 0 : i64, tpu.core_type = #tpu.core_type<tc>, window_params = [{transform_indices = @transform_0, window_bounds = array<i64: 16, 128>}, {pipeline_mode = #tpu.pipeline_mode<synchronous>, transform_indices = @transform_1, window_bounds = array<i64: 128, 128>}, {pipeline_mode = #tpu.pipeline_mode<synchronous>, transform_indices = @transform_2, window_bounds = array<i64: 1, 128>}, {transform_indices = @transform_3, window_bounds = array<i64: 16, 128>}]} {
    %c0 = arith.constant 0 : index
    %c0_0 = arith.constant 0 : index
    %0 = vector.load %arg1[%c0, %c0_0] : memref<16x128xbf16, #tpu.memory_space<vmem>>, vector<16x128xbf16>
    %c0_1 = arith.constant 0 : index
    %c0_2 = arith.constant 0 : index
    %1 = vector.load %arg2[%c0_1, %c0_2] : memref<128x128xf32, #tpu.memory_space<vmem>>, vector<128x128xf32>
    %2 = arith.truncf %1 : vector<128x128xf32> to vector<128x128xbf16>
    %cst = arith.constant dense<0.000000e+00> : vector<16x128xf32>
    %3 = tpu.matmul %0, %2, %cst {dimension_numbers = #tpu.dot_dimension_numbers<[1], [0], [0], [1], [0, 0, 1, 1], [], []>} : vector<16x128xbf16>, vector<128x128xbf16>, vector<16x128xf32> -> vector<16x128xf32>
    %c0_3 = arith.constant 0 : index
    %c0_4 = arith.constant 0 : index
    %4 = vector.load %arg3[%c0_3, %c0_4] : memref<1x128xf32, #tpu.memory_space<vmem>>, vector<1x128xf32>
    %5 = vector.broadcast %4 : vector<1x128xf32> to vector<16x128xf32>
    %6 = arith.addf %3, %5 : vector<16x128xf32>
    %cst_5 = arith.constant dense<0xFF800000> : vector<16xf32>
    %7 = vector.multi_reduction <maximumf>, %6, %cst_5 [1] : vector<16x128xf32> to vector<16xf32>
    %8 = vector.shape_cast %7 : vector<16xf32> to vector<16x1xf32>
    %9 = vector.broadcast %8 : vector<16x1xf32> to vector<16x128xf32>
    %10 = arith.subf %6, %9 : vector<16x128xf32>
    %11 = math.exp %10 : vector<16x128xf32>
    %12 = vector.broadcast %8 : vector<16x1xf32> to vector<16x128xf32>
    %13 = arith.subf %6, %12 : vector<16x128xf32>
    %cst_6 = arith.constant dense<0.000000e+00> : vector<16xf32>
    %14 = vector.multi_reduction <add>, %11, %cst_6 [1] : vector<16x128xf32> to vector<16xf32>
    %15 = vector.shape_cast %14 : vector<16xf32> to vector<16x1xf32>
    %16 = math.log %15 : vector<16x1xf32>
    %17 = vector.broadcast %16 : vector<16x1xf32> to vector<16x128xf32>
    %18 = arith.subf %13, %17 : vector<16x128xf32>
    %c0_7 = arith.constant 0 : index
    %c0_8 = arith.constant 0 : index
    %19 = vector.load %arg4[%c0_7, %c0_8] : memref<16x128xf32, #tpu.memory_space<vmem>>, vector<16x128xf32>
    tpu.vector_store %arg4[%c0_7, %c0_8], %18 {strides = array<i32>} : memref<16x128xf32, #tpu.memory_space<vmem>>, vector<16x128xf32>,
    return
  }
  func.func @transform_0(%arg0: i32) -> (i32, i32) {
    %c0_i32 = arith.constant 0 : i32
    %c0_i32_0 = arith.constant 0 : i32
    return %arg0, %c0_i32 : i32, i32
  }
  func.func @transform_1(%arg0: i32) -> (i32, i32) {
    %c0_i32 = arith.constant 0 : i32
    %c0_i32_0 = arith.constant 0 : i32
    %c0_i32_1 = arith.constant 0 : i32
    return %c0_i32, %c0_i32_0 : i32, i32
  }
  func.func @transform_2(%arg0: i32) -> (i32, i32) {
    %c0_i32 = arith.constant 0 : i32
    %c0_i32_0 = arith.constant 0 : i32
    %c0_i32_1 = arith.constant 0 : i32
    return %c0_i32, %c0_i32_0 : i32, i32
  }
  func.func @transform_3(%arg0: i32) -> (i32, i32) {
    %c0_i32 = arith.constant 0 : i32
    %c0_i32_0 = arith.constant 0 : i32
    return %arg0, %c0_i32 : i32, i32
  }
}

</mosaic_0001>

<bundles_post_ra>
// kernel: fwd.5
= control target key start
LH: loop header
LB: loop body
LE: loop exit
PB: predicated region body
PF: predicated region fallthrough
CT: control target
= control target key end

     0   :  { %v97_v0 = vmov 0.0   ;;  %vm98_vm0 = vmmov 0   ;;  %vm31_vm1 = vcmask 261120   ;;  %s146_s1 = inlined_call_operand.vmem [shape: f32[32,32], index: 1, kind: input, shape index: {}]   ;;  %s147_s0 = inlined_call_operand.vmem [shape: f32[16,32], index: 0, kind: input, shape index: {}]   ;;  %s148_s2 = inlined_call_operand.vmem [shape: f32[1,32], index: 2, kind: input, shape index: {}]   ;;  %s149_s3 = inlined_call_operand.vmem [shape: f32[16,32], index: 3, kind: output, shape index: {}]  }
   0x1   :  { %87 = vmatprep.subr.bf16.mxu0 %v97_v0  ;;  %v20_v1 = vld [vmem:[%s146_s1 + $0x10] sm:$0xff]  ;;  %v21_v2 = vld [vmem:[%s146_s1 + $0x18] sm:$0xff]  ;;  %v18_v3 = vld [vmem:[%s146_s1] sm:$0xff]  ;;  %91 = vmatprep.mubr.msk.bf16.mxu0 %vm98_vm0, %v97_v0 }
   0x2   :  { %v23_v4 = vpack.c.bf16 %v21_v2, %v20_v1  ;;  %v19_v5 = vld [vmem:[%s146_s1 + $0x8] sm:$0xff]  ;;  %v15_v7 = vld [vmem:[%s147_s0] sm:$0xff] }
   0x3   :  { %v22_v6 = vpack.c.bf16 %v19_v5, %v18_v3  ;;  %v16_v8 = vld [vmem:[%s147_s0 + $0x8] sm:$0xff]  ;;  %v82_v10 = vld [vmem:[%s148_s2] ss:$0 sm:$0xff] }
   0x4   :  { %88 = vmatpush3.bf16.msra.mxu0 %v23_v4  ;;  %v17_v9 = vpack.c.bf16 %v16_v8, %v15_v7 }
   0x5   :  { %89 = vmatprep.subr.bf16.mxu0 %v97_v0 }
   0x8   :  { %90 = vmatpush3.bf16.msra.mxu0 %v22_v6 }
   0xb   :  { %92 = vmatmul.mubr.msk.bf16.vlgmr.msra.gmra.mxu0 %vm31_vm1, %v17_v9 }
  0xcb   :  { %v69_v11 = vpop.f32.mrf.mxu0 }
  0xcc   :  { %v70_v12 = vadd.f32 %v82_v10, %v69_v11 }
  0xcd   :  { %v93_v13 = vpop.f32.mrf.mxu0 }
  0xce   :  { %76 = vst.msk [vmem:[%s149_s3] sm:$0xff] %vm31_vm1, %v70_v12 }
  0xcf   :  { %v72_v14 = vpop.f32.mrf.mxu0 }
  0xd0   :  { %v73_v15 = vadd.f32 %v82_v10, %v72_v14 }
  0xd1   :  { %v94_v16 = vpop.f32.mrf.mxu0 }
  0xd2   :  { %77 = vst.msk [vmem:[%s149_s3 + $0x8] sm:$0xff] %vm31_vm1, %v73_v15 }

// kernel: fwd.7
= control target key start
LH: loop header
LB: loop body
LE: loop exit
PB: predicated region body
PF: predicated region fallthrough
CT: control target
= control target key end

     0   :  { %v192_v0 = vmov 0.0   ;;  %vm193_vm0 = vmmov 0   ;;  %vm37_vm1 = vcmask 261120   ;;  %v194_v22 = vmov 0   ;;  %s281_s1 = inlined_call_operand.vmem [shape: f32[32,32], index: 1, kind: input, shape index: {}]   ;;  %s282_s0 = inlined_call_operand.vmem [shape: f32[16,32], index: 0, kind: input, shape index: {}]   ;;  %s283_s3 = inlined_call_operand.vmem [shape: f32[32,256], index: 3, kind: input, shape index: {}]   ;;  %s284_s2 = inlined_call_operand.vmem [shape: f32[1,32], index: 2, kind: input, shape index: {}]   ;;  %s285_s4 = inlined_call_operand.vmem [shape: f32[1,256], index: 4, kind: input, shape index: {}]   ;;  %s286_s5 = inlined_call_operand.vmem [shape: bf16[16,256], index: 5, kind: output, shape index: {}]  }
   0x1   :  { %181 = vmatprep.subr.bf16.mxu0 %v192_v0  ;;  %v26_v1 = vld [vmem:[%s281_s1 + $0x10] sm:$0xff]  ;;  %v27_v2 = vld [vmem:[%s281_s1 + $0x18] sm:$0xff]  ;;  %v24_v3 = vld [vmem:[%s281_s1] sm:$0xff]  ;;  %185 = vmatprep.mubr.msk.bf16.mxu0 %vm193_vm0, %v192_v0  ;;  %v97_v31 = vlaneseq }
   0x2   :  { %v29_v4 = vpack.c.bf16 %v27_v2, %v26_v1  ;;  %v25_v5 = vld [vmem:[%s281_s1 + $0x8] sm:$0xff]  ;;  %v21_v7 = vld [vmem:[%s282_s0] sm:$0xff]  ;;  %v90_v11 = vld [vmem:[%s283_s3 + $0x38] sm:$0xff]  ;;  %142 = vmatprep.mubr.bf16.mxu1 %v194_v22 }
   0x3   :  { %v28_v6 = vpack.c.bf16 %v25_v5, %v24_v3  ;;  %v22_v8 = vld [vmem:[%s282_s0 + $0x8] sm:$0xff]  ;;  %v87_v13 = vld [vmem:[%s283_s3 + $0x20] sm:$0xff]  ;;  %v89_v14 = vld [vmem:[%s283_s3 + $0x30] sm:$0xff]  ;;  %v98_v32 = vshrl.u32 %v97_v31, 7 }
   0x4   :  { %182 = vmatpush3.bf16.msra.mxu0 %v29_v4  ;;  %v23_v9 = vpack.c.bf16 %v22_v8, %v21_v7  ;;  %v88_v10 = vld [vmem:[%s283_s3 + $0x28] sm:$0xff]  ;;  %v93_v15 = vpack.c.bf16 %v89_v14, %v87_v13  ;;  %v86_v17 = vld [vmem:[%s283_s3 + $0x18] sm:$0xff]  ;;  %v83_v19 = vld [vmem:[%s283_s3] sm:$0xff] }
   0x5   :  { %183 = vmatprep.subr.bf16.mxu0 %v192_v0  ;;  %v94_v12 = vpack.c.bf16 %v90_v11, %v88_v10  ;;  %v84_v16 = vld [vmem:[%s283_s3 + $0x8] sm:$0xff]  ;;  %v85_v20 = vld [vmem:[%s283_s3 + $0x10] sm:$0xff]  ;;  %v171_v24 = vld [vmem:[%s284_s2] ss:$0 sm:$0xff]  ;;  %v99_v33 = vsub.s32 0, %v98_v32  ;;  %v103_v34 = vsub.s32 1, %v98_v32 }
   0x6   :  { %v92_v18 = vpack.c.bf16 %v86_v17, %v84_v16  ;;  %v91_v21 = vpack.c.bf16 %v85_v20, %v83_v19  ;;  %v95_v35 = vld [vmem:[%s285_s4] sm:$0x3] }
   0x7   :  { %122 = vmatprep.subr.bf16.mxu1 %v94_v12  ;;  %v100_v36 = vrot.slane %v95_v35, %v99_v33  ;;  %v104_v37 = vrot.slane %v95_v35, %v103_v34 }
   0x8   :  { %184 = vmatpush3.bf16.msra.mxu0 %v28_v6  ;;  %123 = vmatpush1.bf16.msra.mxu1 %v93_v15 }
   0x9   :  { %124 = vmatprep.subr.bf16.mxu1 %v92_v18 }
   0xb   :  { %186 = vmatmul.mubr.msk.bf16.vlgmr.msra.gmra.mxu0 %vm37_vm1, %v23_v9 }
   0xc   :  { %125 = vmatpush1.bf16.msra.mxu1 %v91_v21 }
  0xcb   :  { %v75_v23 = vpop.f32.mrf.mxu0 }
  0xcc   :  { %v76_v27 = vadd.f32 %v171_v24, %v75_v23 }
  0xcd   :  { %v187_v25 = vpop.f32.mrf.mxu0 }
  0xcf   :  { %v78_v26 = vpop.f32.mrf.mxu0 }
  0xd0   :  { %v79_v28 = vadd.f32 %v171_v24, %v78_v26 }
  0xd1   :  { %v188_v29 = vpop.f32.mrf.mxu0 }
  0xd2   :  { %v82_v30 = vpack.c.bf16 %v79_v28, %v76_v27 }
  0xd4   :  { %173 = vmatmul.mubr.msk.bf16.vlgmr.msra.gmra.mxu1 %vm37_vm1, %v82_v30 }
 0x194   :  { %v144_v38 = vpop.f32.mrf.mxu1 }
 0x195   :  { %v145_v40 = vadd.f32 %v144_v38, %v100_v36 }
 0x196   :  { %v146_v39 = vpop.f32.mrf.mxu1 }
 0x197   :  { %v147_v41 = vadd.f32 %v146_v39, %v104_v37 }
 0x198   :  { %v148_v42 = vpop.f32.mrf.mxu1 }
 0x199   :  { %v176_v43 = vpack.c.bf16 %v147_v41, %v145_v40  ;;  %v149_v45 = vadd.f32 %v148_v42, %v100_v36 }
 0x19a   :  { %v150_v44 = vpop.f32.mrf.mxu1 }
 0x19b   :  { %165 = vst [vmem:[%s286_s5] sm:$0xff] %v176_v43  ;;  %v151_v46 = vadd.f32 %v150_v44, %v104_v37 }
 0x19d   :  { %v177_v47 = vpack.c.bf16 %v151_v46, %v149_v45 }
 0x19f   :  { %166 = vst [vmem:[%s286_s5 + $0x8] sm:$0xff] %v177_v47 }

// kernel: fwd.6
= control target key start
LH: loop header
LB: loop body
LE: loop exit
PB: predicated region body
PF: predicated region fallthrough
CT: control target
= control target key end

     0   :  { %s1806_s18 = smov 0   ;;  %s1808_s19 = smov 0   ;;  %s2032_s0 = inlined_call_operand.vmem [shape: f32[2,8,32], index: 0, kind: input, shape index: {}, may-alias: {0,1}]   ;;  %s2033_s1 = inlined_call_operand.vmem [shape: f32[2,8,32], index: 1, kind: input, shape index: {}, may-alias: {0,1}]   ;;  %s2034_s2 = inlined_call_operand.vmem [shape: f32[2,1,8], index: 2, kind: input, shape index: {}]   ;;  %s2035_s3 = inlined_call_operand.vmem [shape: f32[32,96], index: 3, kind: input, shape index: {}]   ;;  %s2036_s4 = inlined_call_operand.vmem [shape: f32[1,96], index: 4, kind: input, shape index: {}]   ;;  %s2037_s5 = inlined_call_operand.vmem [shape: f32[32,32], index: 5, kind: input, shape index: {}]   ;;  %s2038_s6 = inlined_call_operand.vmem [shape: f32[1,32], index: 6, kind: input, shape index: {}]   ;;  %s2039_s7 = inlined_call_operand.vmem [shape: f32[1,32], index: 7, kind: input, shape index: {}]   ;;  %s2040_s8 = inlined_call_operand.vmem [shape: f32[1,32], index: 8, kind: input, shape index: {}]   ;;  %s2041_s9 = inlined_call_operand.vmem [shape: f32[32,64], index: 9, kind: input, shape index: {}]   ;;  %s2042_s10 = inlined_call_operand.vmem [shape: f32[1,64], index: 10, kind: input, shape index: {}]   ;;  %s2043_s11 = inlined_call_operand.vmem [shape: f32[64,32], index: 11, kind: input, shape index: {}]   ;;  %s2044_s12 = inlined_call_operand.vmem [shape: f32[1,32], index: 12, kind: input, shape index: {}]   ;;  %s2045_s13 = inlined_call_operand.vmem [shape: f32[1,32], index: 13, kind: input, shape index: {}]   ;;  %s2046_s14 = inlined_call_operand.vmem [shape: f32[1,32], index: 14, kind: input, shape index: {}]   ;;  %s2047_s15 = inlined_call_operand.vmem [shape: bf16[2,8,32], index: 15, kind: output, shape index: {}]  }
   0x1   :  { %s1810_s20 = smov 0  }
   0x2 LB: > { %s37_s21 = sadd.s32 1, %s1707_s19  ;;  %p1480_p0 = scmp.ge.s32.totalorder %s1711_s20, 1  ;;  %s1711_s20 = sphi %s1810_s20, %s25_s20   ;;  %s1707_s19 = sphi %s1808_s19, %s2049_s19   ;;  %s1703_s18 = sphi %s1806_s18, %s2048_s18  }
   0x3   : > { %p39_p1 = scmp.ge.s32.totalorder %s37_s21, 2  ;;  %p472_p2 = scmp.lt.s32.totalorder %s1711_s20, 3 }
   0x5   : > { %s2051_s21 = smov (%p39_p1, %s37_s21), 0  ;;  %p473_p3 = pnand %p1480_p0, %p472_p2 }
   0x6   : > { %p531_p4 = scmp.lt.s32.totalorder (!%p473_p3), %s1703_s18, 1  ;;  %s1715_s17 = smov (!%p473_p3), 96  }
   0x7   : > { %476 = sbr.rel (%p473_p3) target bundleno = 2544 (0x9f0), region = 80  ;;  %s1716_s29 = smov (!%p473_p3), 120  }
   0x8   : > { %s1717_s30 = smov (!%p473_p3), 112   ;;  %s1718_s16 = smov (!%p473_p3), 104  }
   0x9   : > { %s1721_s26 = smov (!%p473_p3), 72   ;;  %s1722_s27 = smov (!%p473_p3), 80  }
   0xc   : > { %v560_v0 = vld [vmem:[%s2035_s3 + $0x10] sm:$0xff]  ;;  %v561_v1 = vld [vmem:[%s2035_s3 + $0x18] sm:$0xff]  ;;  %v558_v2 = vld [vmem:[%s2035_s3] sm:$0xff]  ;;  %v1713_v5 = vmov 0.0   ;;  %vm1714_vm0 = vmmov 0   ;;  %s2053_s18 = smov (!%p531_p4, %s1703_s18), 1  ;;  %v674_v37 = vlaneseq }
   0xd   : > { %v563_v3 = vpack.c.bf16 %v561_v1, %v560_v0  ;;  %v559_v4 = vld [vmem:[%s2035_s3 + $0x8] sm:$0xff]  ;;  %1540 = vmatprep.subr.bf16.mxu1 %v1713_v5  ;;  %1544 = vmatprep.mubr.msk.bf16.mxu1 %vm1714_vm0, %v1713_v5  ;;  %v1484_v6 = vld [vmem:[%s2036_s4] ss:$0 sm:$0xff]  ;;  %s1481_s22 = sshll.u32 %s2053_s18, 3  ;;  %vm572_vm1 = vcmask 261120   ;;  %vm679_vm2 = vcmask 64512   ;;  %s544_s24 = scalar_lea.vmem %s2034_s2, %s2053_s18 }
   0xe   : > { %625 = vrot.lane.b32.xlu1 %v1484_v6, %s1715_s17  ;;  %1556 = vmatprep.subr.bf16.mxu0 %v1713_v5  ;;  %v562_v7 = vpack.c.bf16 %v559_v4, %v558_v2  ;;  %s537_s25 = scalar_lea.vmem %s2032_s0, %s1481_s22  ;;  %s541_s28 = scalar_lea.vmem %s2033_s1, %s1481_s22  ;;  %v555_v38 = vld [vmem:[%s544_s24] sm:$0x1]  ;;  %v675_v39 = vshrl.u32 %v674_v37, 7  ;;  %v1719_v41 = vmov -1e+30   ;;  %vm744_vm4 = vcmask 1043456  }
   0xf   : > { %621 = vrot.lane.b32.xlu0 %v563_v3, %s1715_s17  ;;  %1541 = vmatpush3.bf16.msra.mxu1 %v563_v3  ;;  %v1855_v8 = vld [vmem:[%s537_s25] sm:$0xff]  ;;  %vm556_vm3 = vcmp.gt.f32.partialorder %v555_v38, 0.0  ;;  %s1720_s25 = smov 88   ;;  %vm1132_vm5 = vcmask 130048   ;;  %vm1134_vm6 = vcmask 195584   ;;  %vm1296_vm7 = vcmask 523264  }
  0x10   : > { %1542 = vmatprep.subr.bf16.mxu1 %v1713_v5  ;;  %1558 = vmatprep.mubr.msk.bf16.mxu0 %vm1714_vm0, %v1713_v5  ;;  %v564_v9 = vpack.c.bf16 %v1855_v8, %v1855_v8  ;;  %v554_v11 = vld [vmem:[%s541_s28] sm:$0xff]  ;;  %v676_v40 = vsub.s32 0, %v675_v39  ;;  %v557_v42 = vsel %vm556_vm3, 0.0, %v1719_v41  ;;  %s1483_s22 = sshll.u32 %s2053_s18, 2  ;;  %vm1379_vm8 = vcmask 257024  }
  0x11   : > { %v616_v12 = vpack.c.bf16 %v554_v11, %v554_v11 }
  0x12   : > { %v677_v43 = vrot.slane %v557_v42, %v676_v40 }
  0x13   : > { %619 = vrot.lane.b32.xlu0 %v562_v7, %s1715_s17  ;;  %1543 = vmatpush3.bf16.msra.mxu1 %v562_v7 }
  0x14   : > { %1548 = vmatprep.subr.bf16.mxu1 %v1713_v5 }
  0x16   : > { %1545 = vmatmul.mubr.msk.bf16.vlgmr.msra.gmra.mxu1 %vm572_vm1, %v564_v9 }
  0x17   : > { %1552 = vmatprep.mubr.msk.bf16.mxu1 %vm1714_vm0, %v1713_v5 }
  0x80   : > { %v626_v20 = vpop.permute.xlu1 %625 }
  0x81   : > { %v622_v10 = vpop.permute.xlu0 %621 }
  0x82   : > { %1549 = vmatpush3.bf16.msra.mxu1 %v622_v10 }
  0x83   : > { %1550 = vmatprep.subr.bf16.mxu1 %v1713_v5 }
  0x85   : > { %v620_v13 = vpop.permute.xlu0 %619 }
  0x86   : > { %1551 = vmatpush3.bf16.msra.mxu1 %v620_v13 }
  0x87   : > { %1562 = vmatprep.subr.bf16.mxu1 %v1713_v5 }
  0x89   : > { %1553 = vmatmul.mubr.msk.bf16.vlgmr.msra.gmra.mxu1 %vm572_vm1, %v616_v12 }
  0x8a   : > { %1564 = vmatprep.mubr.msk.bf16.mxu1 %vm1714_vm0, %v1713_v5 }
  0xd6   : > { %v610_v14 = vpop.f32.mrf.mxu1 }
  0xd7   : > { %v611_v15 = vadd.f32 %v1484_v6, %v610_v14 }
  0xd8   : > { %v1546_v16 = vpop.f32.mrf.mxu1 }
  0xd9   : > { %v671_v17 = vpack.c.bf16 %v611_v15, %v611_v15 }
  0xda   : > { %v613_v18 = vpop.f32.mrf.mxu1 }
  0xdb   : > { %789 = vrot.lane.b32.xlu0 %v671_v17, %s1716_s29 }
  0xdc   : > { %v1547_v19 = vpop.f32.mrf.mxu1 }
  0xdf   : > { %899 = vrot.lane.b32.xlu0 %v671_v17, %s1717_s30 }
  0xe3   : > { %1009 = vrot.lane.b32.xlu0 %v671_v17, %s1718_s16 }
 0x149   : > { %v665_v21 = vpop.f32.mrf.mxu1 }
 0x14a   : > { %v666_v22 = vadd.f32 %v665_v21, %v626_v20 }
 0x14b   : > { %v1554_v23 = vpop.f32.mrf.mxu1 }
 0x14c   : > { %v1871_v24 = vpack.c.bf16 %v666_v22, %v666_v22 }
 0x14d   : > { %v668_v25 = vpop.f32.mrf.mxu1  ;;  %v790_v31 = vpop.permute.xlu0 %789 }
 0x14e   : > { %791 = vrot.lane.b32.xlu1 %v1871_v24, %s1716_s29  ;;  %v684_v26 = vsel %vm679_vm2, %v1871_v24, 0 }
 0x14f   : > { %v1555_v27 = vpop.f32.mrf.mxu1  ;;  %1557 = vmatpush3.bf16.xpose.msra.mxu0 %v684_v26 }
 0x150   : > { %1568 = vmatprep.subr.bf16.mxu0 %v1713_v5 }
 0x151   : > { %v900_v34 = vpop.permute.xlu0 %899 }
 0x152   : > { %901 = vrot.lane.b32.xlu1 %v1871_v24, %s1717_s30 }
 0x155   : > { %v1010_v36 = vpop.permute.xlu0 %1009 }
 0x156   : > { %1011 = vrot.lane.b32.xlu1 %v1871_v24, %s1718_s16  ;;  %1559 = vmatmul.mubr.msk.bf16.vlgmr.msra.gmra.mxu0 %vm679_vm2, %v671_v17 }
 0x157   : > { %1570 = vmatprep.mubr.msk.bf16.mxu0 %vm1714_vm0, %v1713_v5 }
 0x1c0   : > { %v792_v28 = vpop.permute.xlu1 %791 }
 0x1c1   : > { %v797_v29 = vsel %vm679_vm2, %v792_v28, 0 }
 0x1c2   : > { %1569 = vmatpush3.bf16.xpose.msra.mxu0 %v797_v29 }
 0x1c3   : > { %1580 = vmatprep.subr.bf16.mxu0 %v1713_v5 }
 0x1c4   : > { %v902_v30 = vpop.permute.xlu1 %901 }
 0x1c5   : > { %v907_v32 = vsel %vm679_vm2, %v902_v30, 0 }
 0x1c8   : > { %v1012_v33 = vpop.permute.xlu1 %1011 }
 0x1c9   : > { %1571 = vmatmul.mubr.msk.bf16.vlgmr.msra.gmra.mxu0 %vm679_vm2, %v790_v31  ;;  %v1017_v35 = vsel %vm679_vm2, %v1012_v33, 0 }
 0x1ca   : > { %1581 = vmatpush3.bf16.xpose.msra.mxu0 %v907_v32  ;;  %1582 = vmatprep.mubr.msk.bf16.mxu0 %vm1714_vm0, %v1713_v5 }
 0x1cb   : > { %1592 = vmatprep.subr.bf16.mxu0 %v1713_v5 }
 0x1d1   : > { %1583 = vmatmul.mubr.msk.bf16.vlgmr.msra.gmra.mxu0 %vm679_vm2, %v900_v34 }
 0x1d2   : > { %1593 = vmatpush3.bf16.xpose.msra.mxu0 %v1017_v35  ;;  %1594 = vmatprep.mubr.msk.bf16.mxu0 %vm1714_vm0, %v1713_v5 }
 0x1d3   : > { %1604 = vmatprep.subr.bf16.mxu0 %v1713_v5 }
 0x1d9   : > { %1595 = vmatmul.mubr.msk.bf16.vlgmr.msra.gmra.mxu0 %vm679_vm2, %v1010_v36 }
 0x1da   : > { %1608 = vmatprep.mubr.msk.bf16.mxu0 %vm1714_vm0, %v1713_v5 }
 0x216   : > { %v720_v44 = vpop.f32.mrf.mxu0 }
 0x217   : > { %v721_v45 = vadd.f32 %v720_v44, %v677_v43 }
 0x218   : > { %v1560_v46 = vpop.f32.mrf.mxu0 }
 0x219   : > { %v726_v47 = vsel %vm679_vm2, %v721_v45, -inf }
 0x21a   : > { %727 = vmax.xlane.f32.xlu1 %v726_v47  ;;  %v723_v48 = vpop.f32.mrf.mxu0 }
 0x21c   : > { %v1561_v49 = vpop.f32.mrf.mxu0 }
 0x289   : > { %v833_v50 = vpop.f32.mrf.mxu0 }
 0x28a   : > { %v834_v51 = vadd.f32 %v833_v50, %v677_v43 }
 0x28b   : > { %v1572_v52 = vpop.f32.mrf.mxu0 }
 0x28c   : > { %v839_v53 = vsel %vm679_vm2, %v834_v51, -inf }
 0x28d   : > { %840 = vmax.xlane.f32.xlu0 %v839_v53  ;;  %v836_v54 = vpop.f32.mrf.mxu0 }
 0x28f   : > { %v1573_v55 = vpop.f32.mrf.mxu0 }
 0x291   : > { %v943_v56 = vpop.f32.mrf.mxu0 }
 0x292   : > { %v944_v57 = vadd.f32 %v943_v56, %v677_v43 }
 0x293   : > { %v1584_v58 = vpop.f32.mrf.mxu0 }
 0x294   : > { %v949_v59 = vsel %vm679_vm2, %v944_v57, -inf  ;;  %v1139_v58 = vld [vmem:[%s2037_s5 + $0x10] sm:$0xff] }
 0x295   : > { %950 = vmax.xlane.f32.xlu0 %v949_v59  ;;  %v946_v60 = vpop.f32.mrf.mxu0  ;;  %v1140_v59 = vld [vmem:[%s2037_s5 + $0x18] sm:$0xff] }
 0x296   : > { %v1142_v60 = vpack.c.bf16 %v1140_v59, %v1139_v58 }
 0x297   : > { %v1585_v61 = vpop.f32.mrf.mxu0 }
 0x298   : > { %1605 = vmatpush3.bf16.msra.mxu0 %v1142_v60  ;;  %v1137_v61 = vld [vmem:[%s2037_s5] sm:$0xff] }
 0x299   : > { %v1053_v62 = vpop.f32.mrf.mxu0  ;;  %1606 = vmatprep.subr.bf16.mxu0 %v1713_v5 }
 0x29a   : > { %v1054_v63 = vadd.f32 %v1053_v62, %v677_v43  ;;  %v1138_v62 = vld [vmem:[%s2037_s5 + $0x8] sm:$0xff] }
 0x29b   : > { %v1596_v0 = vpop.f32.mrf.mxu0 }
 0x29c   : > { %v1059_v1 = vsel %vm679_vm2, %v1054_v63, -inf }
 0x29d   : > { %1060 = vmax.xlane.f32.xlu1 %v1059_v1  ;;  %v1056_v2 = vpop.f32.mrf.mxu0 }
 0x29f   : > { %v1597_v3 = vpop.f32.mrf.mxu0 }
 0x2a3   : > { %v728_v4 = vpop.xlane.xlu1 %727 }
 0x2a4   : > { %v729_v6 = vsub.f32 %v721_v45, %v728_v4 }
 0x2a6   : > { %v730_v7 = vmul.f32 1.442695, %v729_v6 }
 0x2a8   : > { %1669 = vpow2.f32 %v730_v7 }
 0x2b5   : > { %v1670_v9 = vpop.eup %1669 }
 0x2b6   : > { %v732_v10 = vsel %vm679_vm2, %v1670_v9, 0.0 }
 0x2b7   : > { %733 = vadd.xlane.f32.xlu0 %v732_v10 }
 0x316   : > { %v841_v11 = vpop.xlane.xlu0 %840 }
 0x317   : > { %v842_v12 = vsub.f32 %v834_v51, %v841_v11 }
 0x319   : > { %v843_v13 = vmul.f32 1.442695, %v842_v12 }
 0x31b   : > { %1671 = vpow2.f32 %v843_v13 }
 0x31e   : > { %v951_v14 = vpop.xlane.xlu0 %950 }
 0x31f   : > { %v952_v15 = vsub.f32 %v944_v57, %v951_v14 }
 0x321   : > { %v953_v16 = vmul.f32 1.442695, %v952_v15 }
 0x323   : > { %1673 = vpow2.f32 %v953_v16 }
 0x326   : > { %v1061_v21 = vpop.xlane.xlu1 %1060 }
 0x327   : > { %v1062_v22 = vsub.f32 %v1054_v63, %v1061_v21  ;;  %v1141_v63 = vpack.c.bf16 %v1138_v62, %v1137_v61 }
 0x328   : > { %v1672_v17 = vpop.eup %1671 }
 0x329   : > { %v845_v18 = vsel %vm679_vm2, %v1672_v17, 0.0  ;;  %v1063_v23 = vmul.f32 1.442695, %v1062_v22  ;;  %1607 = vmatpush3.bf16.msra.mxu0 %v1141_v63 }
 0x32a   : > { %846 = vadd.xlane.f32.xlu1 %v845_v18  ;;  %1620 = vmatprep.subr.bf16.mxu0 %v1713_v5  ;;  %v1496_v18 = vld [vmem:[%s2038_s6] ss:$0 sm:$0xff] }
 0x32b   : > { %1675 = vpow2.f32 %v1063_v23 }
 0x330   : > { %v1674_v19 = vpop.eup %1673 }
 0x331   : > { %v955_v20 = vsel %vm679_vm2, %v1674_v19, 0.0 }
 0x332   : > { %956 = vadd.xlane.f32.xlu0 %v955_v20 }
 0x338   : > { %v1676_v25 = vpop.eup %1675 }
 0x339   : > { %v1065_v26 = vsel %vm679_vm2, %v1676_v25, 0.0 }
 0x33b   : > { %851 = vrot.lane.b32.xlu1 %v1871_v24, %s1720_s25  ;;  %s551_s25 = scalar_lea.vmem %s2047_s15, %s1483_s22 }
 0x340   : > { %v734_v27 = vpop.xlane.xlu0 %733 }
 0x341   : > { %1677 = vrcp.f32 %v734_v27 }
 0x348   : > { %739 = vrot.lane.b32.xlu0 %v1871_v24, %s1715_s17  ;;  %s1723_s17 = smov 8  }
 0x34c   : > { %1071 = vrot.lane.b32.xlu0 %v1871_v24, %s1721_s26  ;;  %s1724_s26 = smov 16  }
 0x34e   : > { %v1678_v29 = vpop.eup %1677 }
 0x34f   : > { %v736_v31 = vmul.f32 %v1678_v29, %v1670_v9 }
 0x351   : > { %v737_v35 = vpack.c.bf16 %v736_v31, %v736_v31  ;;  %v1228_v31 = vld [vmem:[%s2041_s9 + $0x10] sm:$0xff] }
 0x35f   : > { %1066 = vadd.xlane.f32.xlu1 %v1065_v26 }
 0x370   : > { %961 = vrot.lane.b32.xlu1 %v1871_v24, %s1722_s27  ;;  %s1725_s27 = smov 24  }
 0x3b3   : > { %v847_v28 = vpop.xlane.xlu1 %846 }
 0x3b4   : > { %1679 = vrcp.f32 %v847_v28 }
 0x3b7   : > { %v852_v34 = vpop.permute.xlu1 %851 }
 0x3b8   : > { %v857_v37 = vsel %vm744_vm4, %v852_v34, 0  ;;  %v1227_v34 = vld [vmem:[%s2041_s9 + $0x8] sm:$0xff] }
 0x3bb   : > { %v957_v30 = vpop.xlane.xlu0 %956 }
 0x3bc   : > { %1681 = vrcp.f32 %v957_v30 }
 0x3bf   : > { %v740_v32 = vpop.permute.xlu0 %739 }
 0x3c0   : > { %v746_v33 = vsel %vm744_vm4, %v740_v32, 0 }
 0x3c1   : > { %1563 = vmatpush3.bf16.msra.mxu1 %v746_v33  ;;  %v1680_v36 = vpop.eup %1679  ;;  %v1226_v33 = vld [vmem:[%s2041_s9] sm:$0xff] }
 0x3c2   : > { %1574 = vmatprep.subr.bf16.mxu1 %v1713_v5  ;;  %v849_v24 = vmul.f32 %v1680_v36, %v1672_v17  ;;  %v1290_v36 = vld [vmem:[%s2043_s11 + $0x30] sm:$0xff] }
 0x3c3   : > { %v1072_v44 = vpop.permute.xlu0 %1071 }
 0x3c4   : > { %1565 = vmatmul.mubr.msk.bf16.vlgmr.msra.gmra.mxu1 %vm679_vm2, %v737_v35  ;;  %v850_v38 = vpack.c.bf16 %v849_v24, %v849_v24  ;;  %v1077_v46 = vsel %vm744_vm4, %v1072_v44, 0  ;;  %v1230_v35 = vpack.c.bf16 %v1227_v34, %v1226_v33  ;;  %v1288_v24 = vld [vmem:[%s2043_s11 + $0x20] sm:$0xff] }
 0x3c5   : > { %1575 = vmatpush3.bf16.msra.mxu1 %v857_v37  ;;  %1576 = vmatprep.mubr.msk.bf16.mxu1 %vm1714_vm0, %v1713_v5  ;;  %v1291_v37 = vld [vmem:[%s2043_s11 + $0x38] sm:$0xff] }
 0x3c6   : > { %1586 = vmatprep.subr.bf16.mxu1 %v1713_v5 }
 0x3c9   : > { %v1682_v39 = vpop.eup %1681 }
 0x3ca   : > { %v959_v41 = vmul.f32 %v1682_v39, %v1674_v19  ;;  %v1289_v39 = vld [vmem:[%s2043_s11 + $0x28] sm:$0xff] }
 0x3cc   : > { %1577 = vmatmul.mubr.msk.bf16.vlgmr.msra.gmra.mxu1 %vm679_vm2, %v850_v38  ;;  %v960_v45 = vpack.c.bf16 %v959_v41, %v959_v41  ;;  %v1295_v38 = vpack.c.bf16 %v1291_v37, %v1290_v36 }
 0x3cd   : > { %1588 = vmatprep.mubr.msk.bf16.mxu1 %vm1714_vm0, %v1713_v5 }
 0x3e8   : > { %v1067_v40 = vpop.xlane.xlu1 %1066 }
 0x3e9   : > { %1683 = vrcp.f32 %v1067_v40  ;;  %v1294_v40 = vpack.c.bf16 %v1289_v39, %v1288_v24 }
 0x3ec   : > { %v962_v42 = vpop.permute.xlu1 %961 }
 0x3ed   : > { %v967_v43 = vsel %vm744_vm4, %v962_v42, 0 }
 0x3ee   : > { %1587 = vmatpush3.bf16.msra.mxu1 %v967_v43 }
 0x3ef   : > { %1598 = vmatprep.subr.bf16.mxu1 %v1713_v5 }
 0x3f1   : > { %1589 = vmatmul.mubr.msk.bf16.vlgmr.msra.gmra.mxu1 %vm679_vm2, %v960_v45  ;;  %v1497_v45 = vld [vmem:[%s2039_s7] ss:$0 sm:$0xff] }
 0x3f2   : > { %1599 = vmatpush3.bf16.msra.mxu1 %v1077_v46  ;;  %1600 = vmatprep.mubr.msk.bf16.mxu1 %vm1714_vm0, %v1713_v5 }
 0x3f3   : > { %1612 = vmatprep.subr.bf16.mxu1 %v1713_v5 }
 0x3f6   : > { %v1684_v47 = vpop.eup %1683 }
 0x3f7   : > { %v1069_v48 = vmul.f32 %v1684_v47, %v1676_v25  ;;  %v1498_v47 = vld [vmem:[%s2040_s8] ss:$0 sm:$0xff] }
 0x3f9   : > { %v1070_v49 = vpack.c.bf16 %v1069_v48, %v1069_v48 }
 0x3fb   : > { %1601 = vmatmul.mubr.msk.bf16.vlgmr.msra.gmra.mxu1 %vm679_vm2, %v1070_v49 }
 0x3fc   : > { %1616 = vmatprep.mubr.msk.bf16.mxu1 %vm1714_vm0, %v1713_v5 }
 0x484   : > { %v782_v50 = vpop.f32.mrf.mxu1 }
 0x486   : > { %v1566_v51 = vpop.f32.mrf.mxu1 }
 0x487   : > { %v1286_v51 = vld [vmem:[%s2043_s11 + $0x10] sm:$0xff] }
 0x488   : > { %v785_v52 = vpop.f32.mrf.mxu1 }
 0x489   : > { %v1287_v52 = vld [vmem:[%s2043_s11 + $0x18] sm:$0xff] }
 0x48a   : > { %v1567_v53 = vpop.f32.mrf.mxu1 }
 0x48b   : > { %v1293_v53 = vpack.c.bf16 %v1287_v52, %v1286_v51 }
 0x48c   : > { %v893_v54 = vpop.f32.mrf.mxu1 }
 0x48d   : > { %1120 = vrot.lane.b32.xlu1 %v893_v54, %s1723_s17  ;;  %v1284_v54 = vld [vmem:[%s2043_s11] sm:$0xff] }
 0x48e   : > { %v1578_v55 = vpop.f32.mrf.mxu1 }
 0x48f   : > { %v1285_v55 = vld [vmem:[%s2043_s11 + $0x8] sm:$0xff] }
 0x490   : > { %v896_v56 = vpop.f32.mrf.mxu1 }
 0x491   : > { %v1292_v56 = vpack.c.bf16 %v1285_v55, %v1284_v54 }
 0x492   : > { %v1579_v57 = vpop.f32.mrf.mxu1 }
 0x493   : > { %v1499_v57 = vld [vmem:[%s2042_s10] ss:$0 sm:$0xff] }
 0x4b1   : > { %v1003_v0 = vpop.f32.mrf.mxu1 }
 0x4b2   : > { %1124 = vrot.lane.b32.xlu0 %v1003_v0, %s1724_s26 }
 0x4b3   : > { %v1590_v1 = vpop.f32.mrf.mxu1 }
 0x4b4   : > { %v1502_v1 = vld [vmem:[%s2044_s12] ss:$0 sm:$0xff] }
 0x4b5   : > { %v1006_v2 = vpop.f32.mrf.mxu1 }
 0x4b7   : > { %v1591_v3 = vpop.f32.mrf.mxu1 }
 0x4bb   : > { %v1113_v4 = vpop.f32.mrf.mxu1 }
 0x4bc   : > { %1128 = vrot.lane.b32.xlu1 %v1113_v4, %s1725_s27 }
 0x4bd   : > { %v1602_v6 = vpop.f32.mrf.mxu1 }
 0x4bf   : > { %v1116_v7 = vpop.f32.mrf.mxu1 }
 0x4c1   : > { %v1603_v9 = vpop.f32.mrf.mxu1 }
 0x4ff   : > { %v1121_v10 = vpop.permute.xlu1 %1120 }
 0x500   : > { %v1131_v12 = vsel %vm679_vm2, %v782_v50, %v1121_v10 }
 0x524   : > { %v1125_v11 = vpop.permute.xlu0 %1124 }
 0x525   : > { %v1133_v13 = vsel %vm1132_vm5, %v1131_v12, %v1125_v11 }
 0x52e   : > { %v1129_v14 = vpop.permute.xlu1 %1128 }
 0x52f   : > { %v1135_v15 = vsel %vm1134_vm6, %v1133_v13, %v1129_v14 }
 0x530   : > { %v1136_v16 = vpack.c.bf16 %v1135_v15, %v1135_v15 }
 0x532   : > { %1609 = vmatmul.mubr.msk.bf16.vlgmr.msra.gmra.mxu0 %vm572_vm1, %v1136_v16 }
 0x533   : > { %1628 = vmatprep.mubr.msk.bf16.mxu0 %vm1714_vm0, %v1713_v5  ;;  %1621 = vmatpush3.bf16.msra.mxu0 %v1295_v38 }
 0x534   : > { %1622 = vmatprep.subr.bf16.mxu0 %v1713_v5 }
 0x537   : > { %1623 = vmatpush3.bf16.msra.mxu0 %v1294_v40 }
 0x538   : > { %1624 = vmatprep.subr.bf16.mxu0 %v1713_v5 }
 0x53b   : > { %1625 = vmatpush3.bf16.msra.mxu0 %v1293_v53 }
 0x53c   : > { %1626 = vmatprep.subr.bf16.mxu0 %v1713_v5 }
 0x53f   : > { %1627 = vmatpush3.bf16.msra.mxu0 %v1292_v56 }
 0x5f2   : > { %v1180_v17 = vpop.f32.mrf.mxu0 }
 0x5f3   : > { %v1186_v19 = vadd.f32 %v1180_v17, %v1855_v8  ;;  %v1229_v8 = vld [vmem:[%s2041_s9 + $0x18] sm:$0xff] }
 0x5f4   : > { %v1610_v20 = vpop.f32.mrf.mxu0  ;;  %v1231_v32 = vpack.c.bf16 %v1229_v8, %v1228_v31 }
 0x5f5   : > { %v1194_v21 = vadd.f32 %v1496_v18, %v1186_v19  ;;  %v1503_v19 = vld [vmem:[%s2045_s13] ss:$0 sm:$0xff] }
 0x5f6   : > { %v1183_v22 = vpop.f32.mrf.mxu0  ;;  %1613 = vmatpush3.bf16.msra.mxu1 %v1231_v32 }
 0x5f7   : > { %v1197_v23 = vsel %vm572_vm1, %v1194_v21, 0.0  ;;  %1614 = vmatprep.subr.bf16.mxu1 %v1713_v5 }
 0x5f8   : > { %1198 = vadd.xlane.f32.xlu0 %v1197_v23  ;;  %v1611_v25 = vpop.f32.mrf.mxu0 }
 0x5fa   : > { %1615 = vmatpush3.bf16.msra.mxu1 %v1230_v35 }
 0x681   : > { %v1199_v26 = vpop.xlane.xlu0 %1198 }
 0x682   : > { %v1201_v27 = vmul.f32 0.03125, %v1199_v26 }
 0x684   : > { %v1202_v28 = vsub.f32 %v1194_v21, %v1201_v27  ;;  %v1504_v21 = vld [vmem:[%s2046_s14] ss:$0 sm:$0xff] }
 0x686   : > { %v1203_v29 = vmul.f32 %v1202_v28, %v1202_v28 }
 0x688   : > { %v1204_v30 = vsel %vm572_vm1, %v1203_v29, 0.0 }
 0x689   : > { %1205 = vadd.xlane.f32.xlu1 %v1204_v30 }
 0x712   : > { %v1206_v41 = vpop.xlane.xlu1 %1205 }
 0x713   : > { %v1207_v42 = vmul.f32 0.03125, %v1206_v41 }
 0x715   : > { %v1208_v43 = vadd.f32 1e-05, %v1207_v42 }
 0x717   : > { %1685 = vrsqrt.f32 %v1208_v43 }
 0x724   : > { %v1686_v44 = vpop.eup %1685 }
 0x725   : > { %v1210_v46 = vmul.f32 %v1686_v44, %v1202_v28 }
 0x727   : > { %v1217_v48 = vmul.f32 %v1497_v45, %v1210_v46 }
 0x729   : > { %v1224_v49 = vadd.f32 %v1498_v47, %v1217_v48 }
 0x72b   : > { %v1225_v50 = vpack.c.bf16 %v1224_v49, %v1224_v49 }
 0x72d   : > { %1617 = vmatmul.mubr.msk.bf16.vlgmr.msra.gmra.mxu1 %vm572_vm1, %v1225_v50 }
 0x7ed   : > { %v1276_v58 = vpop.f32.mrf.mxu1 }
 0x7ee   : > { %v1277_v59 = vadd.f32 %v1499_v57, %v1276_v58 }
 0x7ef   : > { %v1618_v60 = vpop.f32.mrf.mxu1 }
 0x7f0   : > { %v1282_v61 = vmax.f32 %v1277_v59, 0.0 }
 0x7f1   : > { %v1279_v62 = vpop.f32.mrf.mxu1 }
 0x7f2   : > { %v1283_v5 = vpack.c.bf16 %v1282_v61, %v1282_v61 }
 0x7f3   : > { %v1619_v63 = vpop.f32.mrf.mxu1 }
 0x7f4   : > { %1629 = vmatmul.mubr.msk.bf16.vlgmr.msra.gmra.mxu0 %vm1296_vm7, %v1283_v5 }
 0x8b4   : > { %v1334_v0 = vpop.f32.mrf.mxu0 }
 0x8b5   : > { %v1340_v2 = vadd.f32 %v1334_v0, %v1224_v49 }
 0x8b6   : > { %v1630_v3 = vpop.f32.mrf.mxu0 }
 0x8b7   : > { %v1348_v4 = vadd.f32 %v1502_v1, %v1340_v2 }
 0x8b8   : > { %v1337_v6 = vpop.f32.mrf.mxu0 }
 0x8b9   : > { %v1351_v7 = vsel %vm572_vm1, %v1348_v4, 0.0 }
 0x8ba   : > { %1352 = vadd.xlane.f32.xlu0 %v1351_v7  ;;  %v1631_v9 = vpop.f32.mrf.mxu0 }
 0x943   : > { %v1353_v10 = vpop.xlane.xlu0 %1352 }
 0x944   : > { %v1354_v11 = vmul.f32 0.03125, %v1353_v10 }
 0x946   : > { %v1355_v12 = vsub.f32 %v1348_v4, %v1354_v11 }
 0x948   : > { %v1356_v13 = vmul.f32 %v1355_v12, %v1355_v12 }
 0x94a   : > { %v1357_v14 = vsel %vm572_vm1, %v1356_v13, 0.0 }
 0x94b   : > { %1358 = vadd.xlane.f32.xlu0 %v1357_v14 }
 0x9d4   : > { %v1359_v15 = vpop.xlane.xlu0 %1358 }
 0x9d5   : > { %v1360_v16 = vmul.f32 0.03125, %v1359_v15 }
 0x9d7   : > { %v1361_v17 = vadd.f32 1e-05, %v1360_v16 }
 0x9d9   : > { %1687 = vrsqrt.f32 %v1361_v17 }
 0x9e6   : > { %v1688_v18 = vpop.eup %1687 }
 0x9e7   : > { %v1363_v20 = vmul.f32 %v1688_v18, %v1355_v12 }
 0x9e9   : > { %v1370_v22 = vmul.f32 %v1503_v19, %v1363_v20 }
 0x9eb   : > { %v1377_v23 = vadd.f32 %v1504_v21, %v1370_v22 }
 0x9ed   : > { %v1378_v25 = vpack.c.bf16 %v1377_v23, %v1377_v23 }
 0x9ef   : > { %1380 = vst.msk [vmem:[%s551_s25] sm:$0xf] %vm1379_vm8, %v1378_v25 }
 0x9f0 PF: > { %s25_s20 = sadd.s32 1, %s1711_s20   ;;  %s2048_s18 = smov %s1707_s19 }
 0x9f1   : > { %p22_p5 = scmp.ge.s32.totalorder %s25_s20, 4   ;;  %s2049_s19 = smov %s2051_s21 }
 0x9f3   :  { %24 = sbr.rel (!%p22_p5) target bundleno = 2 (0x2), region = 116 }

// kernel: fwd.8
= control target key start
LH: loop header
LB: loop body
LE: loop exit
PB: predicated region body
PF: predicated region fallthrough
CT: control target
= control target key end

     0   :  { %s1777_s30 = smov 0   ;;  %s2068_s0 = inlined_call_operand.vmem [shape: bf16[2,8,32], index: 0, kind: input, shape index: {}]   ;;  %s2069_s1 = inlined_call_operand.vmem [shape: bf16[2,8,256], index: 1, kind: input, shape index: {}]   ;;  %s2070_s2 = inlined_call_operand.vmem [shape: bf16[2,8,8,128], index: 2, kind: input, shape index: {}]   ;;  %s2071_s3 = inlined_call_operand.vmem [shape: f32[2,8,1], index: 3, kind: input, shape index: {}]   ;;  %s2072_s4 = inlined_call_operand.vmem [shape: f32[2,1,8], index: 4, kind: input, shape index: {}]   ;;  %s2073_s5 = inlined_call_operand.vmem [shape: f32[128,32], index: 5, kind: input, shape index: {}]   ;;  %s2074_s6 = inlined_call_operand.vmem [shape: f32[1,32], index: 6, kind: input, shape index: {}]   ;;  %s2075_s7 = inlined_call_operand.vmem [shape: f32[32,4], index: 7, kind: input, shape index: {}]   ;;  %s2076_s8 = inlined_call_operand.vmem [shape: f32[1,4], index: 8, kind: input, shape index: {}]   ;;  %s2077_s9 = inlined_call_operand.vmem [shape: bf16[2,8,128], index: 9, kind: output, shape index: {}]  }
   0x1 LB: > { %s1504_s10 = sadd.s32 4294967295, %s1715_s30   ;;  %p1508_p0 = scmp.ge.s32.totalorder %s1715_s30, 1  ;;  %s1715_s30 = sphi %s1777_s30, %s19_s30  }
   0x2   : > { %p323_p1 = scmp.lt.s32.totalorder %s1715_s30, 3 }
   0x4   : > { %p324_p2 = pnand %p1508_p0, %p323_p1 }
   0x5   : > { %p374_p3 = scmp.lt.s32.totalorder (!%p324_p2), %s1504_s10, 1  ;;  %s1721_s14 = smov (!%p324_p2), 64  }
   0x6   : > { %327 = sbr.rel (%p324_p2) target bundleno = 1257 (0x4e9), region = 56  ;;  %s1722_s15 = smov (!%p324_p2), 96  }
   0x7   : > { %s1725_s16 = smov (!%p324_p2), 32  }
   0xb   : > { %v428_v0 = vld [vmem:[%s2073_s5 + $0x70] sm:$0xff]  ;;  %v429_v1 = vld [vmem:[%s2073_s5 + $0x78] sm:$0xff]  ;;  %v426_v2 = vld [vmem:[%s2073_s5 + $0x60] sm:$0xff]  ;;  %s2079_s10 = smov (!%p374_p3, %s1504_s10), 1  ;;  %v1717_v34 = vmov 0.0   ;;  %vm1718_vm0 = vmmov 0  }
   0xc   : > { %v437_v3 = vpack.c.bf16 %v429_v1, %v428_v0  ;;  %v427_v4 = vld [vmem:[%s2073_s5 + $0x68] sm:$0xff]  ;;  %v424_v6 = vld [vmem:[%s2073_s5 + $0x50] sm:$0xff]  ;;  %v425_v7 = vld [vmem:[%s2073_s5 + $0x58] sm:$0xff]  ;;  %s1540_s23 = sshll.u32 %s2079_s10, 5  ;;  %s1539_s19 = sshll.u32 %s2079_s10, 3  ;;  %vm559_vm1 = vcmask 261120  }
   0xd   : > { %v436_v5 = vpack.c.bf16 %v427_v4, %v426_v2  ;;  %v435_v8 = vpack.c.bf16 %v425_v7, %v424_v6  ;;  %v422_v9 = vld [vmem:[%s2073_s5 + $0x40] sm:$0xff]  ;;  %v423_v10 = vld [vmem:[%s2073_s5 + $0x48] sm:$0xff]  ;;  %s1815_s11 = scalar_lea.vmem %s2070_s2, %s1540_s23  ;;  %v420_v13 = vld [vmem:[%s2073_s5 + $0x30] sm:$0xff]  ;;  %s382_s22 = scalar_lea.vmem %s2069_s1, %s1539_s19  ;;  %vm804_vm3 = vcmask 1043456   ;;  %vm703_vm4 = vcmask 1041409  }
   0xe   : > { %1575 = vmatprep.subr.bf16.mxu0 %v437_v3  ;;  %v1687_v11 = vld [vmem:[%s1815_s11] sm:$0xff]   ;;  %v434_v12 = vpack.c.bf16 %v423_v10, %v422_v9  ;;  %v421_v14 = vld [vmem:[%s2073_s5 + $0x38] sm:$0xff]  ;;  %v419_v17 = vld [vmem:[%s2073_s5 + $0x28] sm:$0xff]  ;;  %s1509_s23 = sshll.u32 %s2079_s10, 2  ;;  %s391_s13 = scalar_lea.vmem %s2071_s3, %s1539_s19  ;;  %vm705_vm5 = vcmask 1042434   ;;  %vm707_vm6 = vcmask 1043459  }
   0xf   : > { %1576 = vmatpush3.bf16.msra.mxu0 %v437_v3  ;;  %1591 = vmatprep.mubr.bf16.mxu0 %v1687_v11  ;;  %v433_v15 = vpack.c.bf16 %v421_v14, %v420_v13  ;;  %v418_v16 = vld [vmem:[%s2073_s5 + $0x20] sm:$0xff]  ;;  %v416_v19 = vld [vmem:[%s2073_s5 + $0x10] sm:$0xff]  ;;  %v417_v20 = vld [vmem:[%s2073_s5 + $0x18] sm:$0xff]  ;;  %s377_s26 = scalar_lea.vmem %s2068_s0, %s1509_s23  ;;  %v1719_v3 = vmov 0   ;;  %vm709_vm7 = vcmask 1044484   ;;  %vm711_vm8 = vcmask 1045509   ;;  %s394_s18 = scalar_lea.vmem %s2072_s4, %s2079_s10 }
  0x10   : > { %1577 = vmatprep.subr.bf16.mxu0 %v436_v5  ;;  %v432_v18 = vpack.c.bf16 %v419_v17, %v418_v16  ;;  %v431_v21 = vpack.c.bf16 %v417_v20, %v416_v19  ;;  %v414_v22 = vld [vmem:[%s2073_s5] sm:$0xff]  ;;  %v415_v23 = vld [vmem:[%s2073_s5 + $0x8] sm:$0xff]  ;;  %v1689_v26 = vld [vmem:[%s1815_s11 + $0x10] sm:$0xff]   ;;  %1677 = vset.pattern.permute.xlu1 %v1719_v3  ;;  %vm713_vm9 = vcmask 1046534   ;;  %vm715_vm10 = vcmask 1047559   ;;  %s398_s21 = scalar_lea.vmem %s2077_s9, %s1509_s23 }
  0x11   : > { %v430_v24 = vpack.c.bf16 %v415_v23, %v414_v22  ;;  %v1688_v25 = vld [vmem:[%s1815_s11 + $0x8] sm:$0xff]   ;;  %v1690_v27 = vld [vmem:[%s1815_s11 + $0x18] sm:$0xff]   ;;  %v548_v28 = vld [vmem:[%s2075_s7 + $0x10] sm:$0xff]  ;;  %1678 = vset.pattern.permute.xlu0 %v1719_v3  ;;  %v1720_v22 = vmov -1e+30   ;;  %vm770_vm11 = vcmask 64512  }
  0x12   : > { %v549_v29 = vld [vmem:[%s2075_s7 + $0x18] sm:$0xff]  ;;  %v546_v31 = vld [vmem:[%s2075_s7] sm:$0xff]  ;;  %v547_v32 = vld [vmem:[%s2075_s7 + $0x8] sm:$0xff]  ;;  %vm1400_vm12 = vcmask 523264   ;;  %vm1402_vm13 = vcmask 785408  }
  0x13   : > { %1578 = vmatpush3.bf16.msra.mxu0 %v436_v5  ;;  %v551_v30 = vpack.c.bf16 %v549_v29, %v548_v28  ;;  %v550_v33 = vpack.c.bf16 %v547_v32, %v546_v31  ;;  %v1516_v37 = vld [vmem:[%s2074_s6] ss:$0 sm:$0xff]  ;;  %v1723_v29 = vmov 2   ;;  %v1726_v31 = vmov 3  }
  0x14   : > { %1579 = vmatprep.subr.bf16.mxu0 %v435_v8  ;;  %v1870_v48 = vld [vmem:[%s382_s22] sm:$0xff] }
  0x15   : > { %1599 = vmatprep.subr.bf16.mxu1 %v551_v30  ;;  %v722_v54 = vsel %vm559_vm1, %v1870_v48, 0  ;;  %v1887_v2 = vld [vmem:[%s377_s26] sm:$0xf]  ;;  %v1528_v32 = vcombine.high %v1870_v48, %v1870_v48 }
  0x16   : > { %1600 = vmatpush3.bf16.msra.mxu1 %v551_v30  ;;  %v1521_v4 = vld [vmem:[%s2076_s8] ss:$0 sm:$0xff]  ;;  %v1724_v30 = vmov 1  }
  0x17   : > { %1580 = vmatpush3.bf16.msra.mxu0 %v435_v8  ;;  %1601 = vmatprep.subr.bf16.mxu1 %v550_v33  ;;  %v402_v17 = vld [vmem:[%s391_s13] sm:$0xff] }
  0x18   : > { %1581 = vmatprep.subr.bf16.mxu0 %v434_v12  ;;  %vm403_vm2 = vcmp.gt.f32.partialorder %v402_v17, 0.0 }
  0x19   : > { %v404_v23 = vsel %vm403_vm2, 0.0, %v1720_v22 }
  0x1a   : > { %1602 = vmatpush3.bf16.msra.mxu1 %v550_v33  ;;  %v806_v33 = vsel %vm804_vm3, %v1528_v32, 0 }
  0x1b   : > { %1582 = vmatpush3.bf16.msra.mxu0 %v434_v12  ;;  %1611 = vmatprep.subr.bf16.mxu1 %v1717_v34 }
  0x1c   : > { %1583 = vmatprep.subr.bf16.mxu0 %v433_v15 }
  0x1f   : > { %1584 = vmatpush3.bf16.msra.mxu0 %v433_v15 }
  0x20   : > { %1585 = vmatprep.subr.bf16.mxu0 %v432_v18 }
  0x23   : > { %1586 = vmatpush3.bf16.msra.mxu0 %v432_v18 }
  0x24   : > { %1587 = vmatprep.subr.bf16.mxu0 %v431_v21 }
  0x27   : > { %1588 = vmatpush3.bf16.msra.mxu0 %v431_v21 }
  0x28   : > { %1589 = vmatprep.subr.bf16.mxu0 %v430_v24 }
  0x2b   : > { %1590 = vmatpush3.bf16.msra.mxu0 %v430_v24 }
  0x2c   : > { %1629 = vmatprep.subr.bf16.mxu0 %v1717_v34 }
  0x2e   : > { %1592 = vmatmul.mubr.bf16.vlgmr.msra.gmra.mxu0 %v1688_v25 }
  0x2f   : > { %1595 = vmatprep.mubr.bf16.mxu0 %v1689_v26 }
  0x36   : > { %1596 = vmatmul.mubr.bf16.gmra.mxu0 %v1690_v27  ;;  %v1530_v27 = vcombine.low %v1870_v48, %v1870_v48 }
  0x37   : > { %1631 = vmatprep.mubr.msk.bf16.mxu0 %vm1718_vm0, %v1717_v34 }
  0xee   : > { %v1593_v35 = vpop.f32.mrf.mxu0 }
  0xef   : > { %v512_v41 = vadd.f32 %v1593_v35, %v1516_v37  ;;  %v669_v35 = vlaneseq }
  0xf0   : > { %v503_v36 = vpop.f32.mrf.mxu0 }
  0xf1   : > { %v504_v39 = vadd.f32 %v1516_v37, %v503_v36  ;;  %v536_v49 = vmax.f32 %v512_v41, 0.0  ;;  %v670_v36 = vand.u32 127, %v669_v35 }
  0xf2   : > { %v1594_v38 = vpop.f32.mrf.mxu0 }
  0xf3   : > { %v515_v40 = vadd.f32 %v1594_v38, %v1516_v37  ;;  %v534_v46 = vmax.f32 %v504_v39, 0.0 }
  0xf4   : > { %v506_v42 = vpop.f32.mrf.mxu0 }
  0xf5   : > { %v507_v43 = vadd.f32 %v1516_v37, %v506_v42  ;;  %v537_v44 = vmax.f32 %v515_v40, 0.0 }
  0xf6   : > { %v1597_v45 = vpop.f32.mrf.mxu0 }
  0xf7   : > { %v535_v47 = vmax.f32 %v507_v43, 0.0  ;;  %v543_v52 = vpack.c.bf16 %v537_v44, %v536_v49  ;;  %v528_v57 = vadd.f32 %v1597_v45, %v1516_v37 }
  0xf8   : > { %v519_v50 = vpop.f32.mrf.mxu0 }
  0xf9   : > { %v542_v51 = vpack.c.bf16 %v535_v47, %v534_v46  ;;  %v520_v55 = vadd.f32 %v1516_v37, %v519_v50  ;;  %v540_v63 = vmax.f32 %v528_v57, 0.0 }
  0xfa   : > { %v1598_v53 = vpop.f32.mrf.mxu0 }
  0xfb   : > { %v531_v56 = vadd.f32 %v1598_v53, %v1516_v37  ;;  %1603 = vmatprep.mubr.msk.bf16.mxu1 %vm559_vm1, %v542_v51  ;;  %v538_v61 = vmax.f32 %v520_v55, 0.0 }
  0xfc   : > { %v522_v58 = vpop.f32.mrf.mxu0  ;;  %1604 = vmatmul.mubr.msk.bf16.vlgmr.msra.gmra.mxu1 %vm559_vm1, %v543_v52 }
  0xfd   : > { %v523_v59 = vadd.f32 %v1516_v37, %v522_v58  ;;  %1612 = vmatpush3.bf16.xpose.msra.mxu1 %v722_v54  ;;  %v541_v60 = vmax.f32 %v531_v56, 0.0  ;;  %v672_v37 = vshrl.u32 %v669_v35, 7 }
  0xfe   : > { %1617 = vmatprep.subr.bf16.mxu1 %v1717_v34 }
  0xff   : > { %v539_v62 = vmax.f32 %v523_v59, 0.0  ;;  %v545_v1 = vpack.c.bf16 %v541_v60, %v540_v63  ;;  %v1921_v40 = vsub.s32 %v670_v36, %v672_v37 }
 0x101   : > { %v544_v0 = vpack.c.bf16 %v539_v62, %v538_v61 }
 0x103   : > { %1607 = vmatprep.mubr.msk.bf16.mxu1 %vm559_vm1, %v544_v0 }
 0x104   : > { %1608 = vmatmul.mubr.msk.bf16.gmra.mxu1 %vm559_vm1, %v545_v1 }
 0x105   : > { %1613 = vmatprep.mubr.msk.bf16.mxu1 %vm1718_vm0, %v1717_v34 }
 0x10c   : > { %1614 = vmatmul.mubr.msk.bf16.vlgmr.msra.gmra.mxu1 %vm559_vm1, %v1887_v2 }
 0x10d   : > { %1619 = vmatprep.mubr.msk.bf16.mxu1 %vm1718_vm0, %v1717_v34  ;;  %1618 = vmatpush3.bf16.msra.mxu1 %v806_v33 }
 0x10e   : > { %1623 = vmatprep.subr.bf16.mxu1 %v1717_v34 }
 0x1bc   : > { %v1605_v5 = vpop.f32.mrf.mxu1 }
 0x1bd   : > { %v1896_v6 = vadd.f32 %v1605_v5, %v1521_v4 }
 0x1be   : > { %v606_v7 = vpop.f32.mrf.mxu1 }
 0x1bf   : > { %v607_v8 = vadd.f32 %v1521_v4, %v606_v7  ;;  %652 = vperm.xlu1 %1677, %v1896_v6  }
 0x1c0   : > { %v1606_v9 = vpop.f32.mrf.mxu1 }
 0x1c1   : > { %v618_v10 = vadd.f32 %v1606_v9, %v1521_v4  ;;  %646 = vperm.xlu0 %1678, %v607_v8  }
 0x1c2   : > { %v609_v11 = vpop.f32.mrf.mxu1 }
 0x1c3   : > { %v610_v12 = vadd.f32 %v1521_v4, %v609_v11  ;;  %655 = vperm.xlu1 %1677, %v618_v10  }
 0x1c4   : > { %v1609_v13 = vpop.f32.mrf.mxu1 }
 0x1c5   : > { %649 = vperm.xlu0 %1678, %v610_v12   ;;  %v631_v19 = vadd.f32 %v1609_v13, %v1521_v4 }
 0x1c6   : > { %v622_v14 = vpop.f32.mrf.mxu1 }
 0x1c7   : > { %v623_v15 = vadd.f32 %v1521_v4, %v622_v14 }
 0x1c8   : > { %v1610_v16 = vpop.f32.mrf.mxu1 }
 0x1c9   : > { %658 = vperm.xlu0 %1678, %v623_v15   ;;  %v634_v25 = vadd.f32 %v1610_v16, %v1521_v4 }
 0x1ca   : > { %v625_v18 = vpop.f32.mrf.mxu1 }
 0x1cb   : > { %v626_v20 = vadd.f32 %v1521_v4, %v625_v18 }
 0x1cc   : > { %v1904_v21 = vpop.f32.mrf.mxu1 }
 0x1cd   : > { %661 = vperm.xlu1 %1677, %v626_v20   ;;  %664 = vperm.xlu0 %1678, %v631_v19  }
 0x1ce   : > { %v1615_v24 = vpop.f32.mrf.mxu1 }
 0x1d0   : > { %v761_v26 = vpop.f32.mrf.mxu1 }
 0x1d1   : > { %667 = vperm.xlu1 %1677, %v634_v25   ;;  %766 = vperm.xlu0 %1678, %v404_v23  }
 0x1d2   : > { %v1616_v28 = vpop.f32.mrf.mxu1 }
 0x1d5   : > { %1029 = vrot.lane.b32.xlu0 %v1530_v27, %s1721_s14  ;;  %850 = vrot.lane.b32.xlu1 %v1530_v27, %s1722_s15 }
 0x1d6   : > { %1681 = vset.pattern.permute.xlu0 %v1723_v29  ;;  %1679 = vset.pattern.permute.xlu1 %v1724_v30 }
 0x1d9   : > { %1035 = vperm.xlu0 %1681, %v610_v12   ;;  %1208 = vrot.lane.b32.xlu1 %v1530_v27, %s1725_s16 }
 0x1dd   : > { %1044 = vperm.xlu0 %1681, %v623_v15   ;;  %856 = vperm.xlu1 %1679, %v610_v12  }
 0x1e1   : > { %1050 = vperm.xlu0 %1681, %v631_v19   ;;  %859 = vperm.xlu1 %1679, %v1896_v6  }
 0x1e5   : > { %1682 = vset.pattern.permute.xlu0 %v1724_v30  ;;  %865 = vperm.xlu1 %1679, %v623_v15  }
 0x1e6   : > { %853 = vperm.xlu0 %1682, %v607_v8  }
 0x1e9   : > { %871 = vperm.xlu1 %1679, %v631_v19  }
 0x1ea   : > { %862 = vperm.xlu0 %1682, %v618_v10  }
 0x1ed   : > { %1680 = vset.pattern.permute.xlu1 %v1723_v29 }
 0x1ee   : > { %874 = vperm.xlu0 %1682, %v634_v25   ;;  %1032 = vperm.xlu1 %1680, %v607_v8  }
 0x1f2   : > { %868 = vperm.xlu0 %1682, %v626_v20   ;;  %1038 = vperm.xlu1 %1680, %v1896_v6  }
 0x1f6   : > { %1683 = vset.pattern.permute.xlu0 %v1726_v31  ;;  %1041 = vperm.xlu1 %1680, %v618_v10  }
 0x1f7   : > { %1211 = vperm.xlu0 %1683, %v607_v8  }
 0x1fa   : > { %1053 = vperm.xlu1 %1680, %v634_v25  }
 0x1fb   : > { %1220 = vperm.xlu0 %1683, %v618_v10  }
 0x1fe   : > { %1684 = vset.pattern.permute.xlu1 %v1726_v31 }
 0x1ff   : > { %1226 = vperm.xlu0 %1683, %v626_v20   ;;  %1214 = vperm.xlu1 %1684, %v610_v12  }
 0x203   : > { %1232 = vperm.xlu0 %1683, %v634_v25   ;;  %1685 = vset.pattern.permute.xlu1 %v1723_v29 }
 0x204   : > { %1047 = vperm.xlu1 %1685, %v626_v20  }
 0x207   : > { %1160 = vrot.lane.b32.xlu0 %v1528_v32, %s1721_s14 }
 0x208   : > { %1686 = vset.pattern.permute.xlu1 %v1726_v31 }
 0x209   : > { %1217 = vperm.xlu1 %1686, %v1896_v6  }
 0x20d   : > { %1223 = vperm.xlu1 %1686, %v623_v15  }
 0x211   : > { %1229 = vperm.xlu1 %1686, %v631_v19  }
 0x215   : > { %981 = vrot.lane.b32.xlu1 %v1528_v32, %s1722_s15 }
 0x219   : > { %1339 = vrot.lane.b32.xlu1 %v1528_v32, %s1725_s16 }
 0x23a   : > { %v653_v38 = vpop.permute.xlu1 %652 }
 0x23b   : > { %v682_v44 = vrot.slane %v653_v38, %v1921_v40 }
 0x23c   : > { %v647_v39 = vpop.permute.xlu0 %646 }
 0x23d   : > { %v674_v42 = vrot.slane %v647_v39, %v1921_v40 }
 0x23e   : > { %v656_v45 = vpop.permute.xlu1 %655 }
 0x23f   : > { %v686_v49 = vrot.slane %v656_v45, %v1921_v40 }
 0x240   : > { %v650_v41 = vpop.permute.xlu0 %649 }
 0x241   : > { %v678_v43 = vrot.slane %v650_v41, %v1921_v40 }
 0x243   : > { %v704_v46 = vsel %vm703_vm4, %v678_v43, %v674_v42 }
 0x244   : > { %v706_v47 = vsel %vm705_vm5, %v682_v44, %v704_v46  ;;  %v659_v48 = vpop.permute.xlu0 %658 }
 0x245   : > { %v690_v50 = vrot.slane %v659_v48, %v1921_v40  ;;  %v708_v51 = vsel %vm707_vm6, %v686_v49, %v706_v47 }
 0x247   : > { %v710_v55 = vsel %vm709_vm7, %v690_v50, %v708_v51 }
 0x248   : > { %v662_v52 = vpop.permute.xlu1 %661  ;;  %v665_v53 = vpop.permute.xlu0 %664 }
 0x249   : > { %v694_v54 = vrot.slane %v662_v52, %v1921_v40  ;;  %v698_v56 = vrot.slane %v665_v53, %v1921_v40 }
 0x24b   : > { %v712_v57 = vsel %vm711_vm8, %v694_v54, %v710_v55 }
 0x24c   : > { %v668_v58 = vpop.permute.xlu1 %667  ;;  %v1935_v59 = vpop.permute.xlu0 %766  ;;  %v714_v61 = vsel %vm713_vm9, %v698_v56, %v712_v57 }
 0x24d   : > { %v702_v60 = vrot.slane %v668_v58, %v1921_v40 }
 0x24f   : > { %v716_v62 = vsel %vm715_vm10, %v702_v60, %v714_v61 }
 0x250   : > { %v759_v63 = vadd.f32 %v1904_v21, %v716_v62  ;;  %v1941_v0 = vpop.permute.xlu0 %1029  ;;  %v1943_v1 = vpop.permute.xlu1 %850 }
 0x252   : > { %v769_v3 = vadd.f32 %v1935_v59, %v759_v63 }
 0x254   : > { %v771_v4 = vsel %vm770_vm11, %v769_v3, -inf  ;;  %v1036_v5 = vpop.permute.xlu0 %1035  ;;  %v1947_v6 = vpop.permute.xlu1 %1208 }
 0x255   : > { %v772_v7 = vrot.slane %v771_v4, 4  ;;  %v1062_v35 = vrot.slane %v1036_v5, %v1921_v40 }
 0x257   : > { %v773_v8 = vmax.f32 %v771_v4, %v772_v7 }
 0x258   : > { %v1045_v9 = vpop.permute.xlu0 %1044  ;;  %v857_v10 = vpop.permute.xlu1 %856 }
 0x259   : > { %v774_v11 = vrot.slane %v773_v8, 2  ;;  %v883_v20 = vrot.slane %v857_v10, %v1921_v40  ;;  %v1074_v4 = vrot.slane %v1045_v9, %v1921_v40 }
 0x25b   : > { %v775_v12 = vmax.f32 %v773_v8, %v774_v11 }
 0x25c   : > { %v1051_v13 = vpop.permute.xlu0 %1050  ;;  %v860_v14 = vpop.permute.xlu1 %859 }
 0x25d   : > { %v776_v15 = vrot.slane %v775_v12, 1  ;;  %v887_v23 = vrot.slane %v860_v14, %v1921_v40  ;;  %v1082_v8 = vrot.slane %v1051_v13, %v1921_v40 }
 0x25f   : > { %v777_v16 = vmax.f32 %v775_v12, %v776_v15 }
 0x260   : > { %v866_v17 = vpop.permute.xlu1 %865 }
 0x261   : > { %v778_v18 = vsub.f32 %v769_v3, %v777_v16  ;;  %v854_v19 = vpop.permute.xlu0 %853  ;;  %v895_v29 = vrot.slane %v866_v17, %v1921_v40 }
 0x262   : > { %v879_v21 = vrot.slane %v854_v19, %v1921_v40 }
 0x263   : > { %v779_v22 = vmul.f32 1.442695, %v778_v18 }
 0x264   : > { %v908_v24 = vsel %vm703_vm4, %v883_v20, %v879_v21  ;;  %v872_v25 = vpop.permute.xlu1 %871 }
 0x265   : > { %1693 = vpow2.f32 %v779_v22  ;;  %v863_v26 = vpop.permute.xlu0 %862  ;;  %v909_v27 = vsel %vm705_vm5, %v887_v23, %v908_v24  ;;  %v903_v43 = vrot.slane %v872_v25, %v1921_v40  ;;  %v1995_v24 = vld [vmem:[%s394_s18] ss:$0 sm:$0xff] }
 0x266   : > { %v891_v28 = vrot.slane %v863_v26, %v1921_v40 }
 0x268   : > { %v910_v30 = vsel %vm707_vm6, %v891_v28, %v909_v27  ;;  %v917_v27 = vsel %vm559_vm1, %v1943_v1, 0  ;;  %v1275_v1 = vsel %vm559_vm1, %v1947_v6, 0 }
 0x269   : > { %v1957_v31 = vpop.permute.xlu0 %874  ;;  %v1033_v32 = vpop.permute.xlu1 %1032  ;;  %v911_v33 = vsel %vm709_vm7, %v895_v29, %v910_v30  ;;  %v1096_v29 = vsel %vm559_vm1, %v1941_v0, 0 }
 0x26a   : > { %v1058_v36 = vrot.slane %v1033_v32, %v1921_v40 }
 0x26c   : > { %v1087_v37 = vsel %vm703_vm4, %v1062_v35, %v1058_v36  ;;  %v907_v36 = vrot.slane %v1957_v31, %v1921_v40 }
 0x26d   : > { %v869_v38 = vpop.permute.xlu0 %868  ;;  %v1039_v39 = vpop.permute.xlu1 %1038 }
 0x26e   : > { %v899_v41 = vrot.slane %v869_v38, %v1921_v40  ;;  %v1066_v42 = vrot.slane %v1039_v39, %v1921_v40 }
 0x270   : > { %v912_v44 = vsel %vm711_vm8, %v899_v41, %v911_v33  ;;  %v1088_v45 = vsel %vm705_vm5, %v1066_v42, %v1087_v37 }
 0x271   : > { %v1042_v46 = vpop.permute.xlu1 %1041  ;;  %v1969_v47 = vsel %vm713_vm9, %v903_v43, %v912_v44 }
 0x272   : > { %v1694_v48 = vpop.eup %1693  ;;  %v1070_v49 = vrot.slane %v1042_v46, %v1921_v40  ;;  %v1212_v56 = vpop.permute.xlu0 %1211  ;;  %v914_v38 = vsel %vm715_vm10, %v907_v36, %v1969_v47 }
 0x273   : > { %v781_v50 = vsel %vm770_vm11, %v1694_v48, 0.0  ;;  %v1237_v60 = vrot.slane %v1212_v56, %v1921_v40 }
 0x274   : > { %v782_v51 = vrot.slane %v781_v50, 4  ;;  %v1089_v52 = vsel %vm707_vm6, %v1070_v49, %v1088_v45 }
 0x275   : > { %v1054_v53 = vpop.permute.xlu1 %1053  ;;  %v1090_v10 = vsel %vm709_vm7, %v1074_v4, %v1089_v52 }
 0x276   : > { %v783_v54 = vadd.f32 %v782_v51, %v781_v50  ;;  %v1086_v11 = vrot.slane %v1054_v53, %v1921_v40  ;;  %v1221_v17 = vpop.permute.xlu0 %1220 }
 0x277   : > { %v1249_v19 = vrot.slane %v1221_v17, %v1921_v40 }
 0x278   : > { %v784_v55 = vrot.slane %v783_v54, 2 }
 0x27a   : > { %v785_v57 = vadd.f32 %v784_v55, %v783_v54  ;;  %v1215_v58 = vpop.permute.xlu1 %1214  ;;  %v1227_v44 = vpop.permute.xlu0 %1226 }
 0x27b   : > { %v1241_v61 = vrot.slane %v1215_v58, %v1921_v40  ;;  %v1257_v52 = vrot.slane %v1227_v44, %v1921_v40 }
 0x27c   : > { %v786_v62 = vrot.slane %v785_v57, 1 }
 0x27d   : > { %v1266_v63 = vsel %vm703_vm4, %v1241_v61, %v1237_v60 }
 0x27e   : > { %v787_v3 = vadd.f32 %v786_v62, %v785_v57  ;;  %v1233_v54 = vpop.permute.xlu0 %1232 }
 0x27f   : > { %v1048_v5 = vpop.permute.xlu1 %1047  ;;  %v1265_v62 = vrot.slane %v1233_v54, %v1921_v40 }
 0x280   : > { %1695 = vrcp.f32 %v787_v3  ;;  %v1078_v7 = vrot.slane %v1048_v5, %v1921_v40 }
 0x282   : > { %v1091_v12 = vsel %vm711_vm8, %v1078_v7, %v1090_v10 }
 0x283   : > { %v1092_v14 = vsel %vm713_vm9, %v1082_v8, %v1091_v12 }
 0x284   : > { %v1218_v15 = vpop.permute.xlu1 %1217  ;;  %v1093_v16 = vsel %vm715_vm10, %v1086_v11, %v1092_v14 }
 0x285   : > { %v1245_v9 = vrot.slane %v1218_v15, %v1921_v40 }
 0x287   : > { %v1267_v18 = vsel %vm705_vm5, %v1245_v9, %v1266_v63 }
 0x288   : > { %v1224_v20 = vpop.permute.xlu1 %1223  ;;  %v1268_v21 = vsel %vm707_vm6, %v1249_v19, %v1267_v18 }
 0x289   : > { %v1253_v13 = vrot.slane %v1224_v20, %v1921_v40 }
 0x28b   : > { %v1269_v22 = vsel %vm709_vm7, %v1253_v13, %v1268_v21 }
 0x28c   : > { %v1230_v0 = vpop.permute.xlu1 %1229  ;;  %v1270_v58 = vsel %vm711_vm8, %v1257_v52, %v1269_v22 }
 0x28d   : > { %v1696_v23 = vpop.eup %1695  ;;  %v1261_v51 = vrot.slane %v1230_v0, %v1921_v40 }
 0x28e   : > { %v789_v25 = vmul.f32 %v1696_v23, %v1694_v48 }
 0x28f   : > { %v1271_v61 = vsel %vm713_vm9, %v1261_v51, %v1270_v58 }
 0x290   : > { %v796_v26 = vmul.f32 %v1995_v24, %v789_v25  ;;  %v982_v30 = vpop.permute.xlu1 %981  ;;  %v1272_v8 = vsel %vm715_vm10, %v1265_v62, %v1271_v61 }
 0x291   : > { %v987_v32 = vsel %vm804_vm3, %v982_v30, 0 }
 0x292   : > { %v797_v28 = vpack.c.bf16 %v796_v26, %v796_v26  ;;  %1630 = vmatpush3.bf16.msra.mxu0 %v987_v32 }
 0x293   : > { %1641 = vmatprep.subr.bf16.mxu0 %v1717_v34 }
 0x294   : > { %1620 = vmatmul.mubr.msk.bf16.vlgmr.msra.gmra.mxu1 %vm770_vm11, %v797_v28 }
 0x295   : > { %1624 = vmatpush3.bf16.xpose.msra.mxu1 %v917_v27  ;;  %1625 = vmatprep.mubr.msk.bf16.mxu1 %vm1718_vm0, %v1717_v34 }
 0x296   : > { %1635 = vmatprep.subr.bf16.mxu1 %v1717_v34 }
 0x29c   : > { %1626 = vmatmul.mubr.msk.bf16.vlgmr.msra.gmra.mxu1 %vm559_vm1, %v1887_v2 }
 0x29d   : > { %1636 = vmatpush3.bf16.xpose.msra.mxu1 %v1096_v29  ;;  %1637 = vmatprep.mubr.msk.bf16.mxu1 %vm1718_vm0, %v1717_v34 }
 0x29e   : > { %1647 = vmatprep.subr.bf16.mxu1 %v1717_v34 }
 0x2a4   : > { %1638 = vmatmul.mubr.msk.bf16.vlgmr.msra.gmra.mxu1 %vm559_vm1, %v1887_v2 }
 0x2a5   : > { %1648 = vmatpush3.bf16.xpose.msra.mxu1 %v1275_v1  ;;  %1649 = vmatprep.mubr.msk.bf16.mxu1 %vm1718_vm0, %v1717_v34 }
 0x2ac   : > { %1650 = vmatmul.mubr.msk.bf16.vlgmr.msra.gmra.mxu1 %vm559_vm1, %v1887_v2 }
 0x354   : > { %v2021_v33 = vpop.f32.mrf.mxu1 }
 0x356   : > { %v1621_v6 = vpop.f32.mrf.mxu1 }
 0x358   : > { %v845_v35 = vpop.f32.mrf.mxu1 }
 0x35a   : > { %v1622_v37 = vpop.f32.mrf.mxu1 }
 0x35c   : > { %v953_v39 = vpop.f32.mrf.mxu1 }
 0x35d   : > { %v954_v2 = vadd.f32 %v953_v39, %v914_v38 }
 0x35e   : > { %v1627_v41 = vpop.f32.mrf.mxu1 }
 0x35f   : > { %v959_v42 = vadd.f32 %v954_v2, %v1935_v59 }
 0x360   : > { %v956_v43 = vpop.f32.mrf.mxu1 }
 0x361   : > { %v960_v45 = vsel %vm770_vm11, %v959_v42, -inf }
 0x362   : > { %v961_v46 = vrot.slane %v960_v45, 4  ;;  %v1628_v48 = vpop.f32.mrf.mxu1 }
 0x364   : > { %v962_v49 = vmax.f32 %v960_v45, %v961_v46  ;;  %v1132_v50 = vpop.f32.mrf.mxu1 }
 0x365   : > { %v1133_v31 = vadd.f32 %v1132_v50, %v1093_v16 }
 0x366   : > { %v963_v53 = vrot.slane %v962_v49, 2  ;;  %v1639_v47 = vpop.f32.mrf.mxu1 }
 0x367   : > { %v1138_v55 = vadd.f32 %v1133_v31, %v1935_v59 }
 0x368   : > { %v964_v56 = vmax.f32 %v962_v49, %v963_v53  ;;  %v1135_v57 = vpop.f32.mrf.mxu1 }
 0x369   : > { %v1139_v60 = vsel %vm770_vm11, %v1138_v55, -inf }
 0x36a   : > { %v965_v63 = vrot.slane %v964_v56, 1  ;;  %v1140_v3 = vrot.slane %v1139_v60, 4  ;;  %v1640_v4 = vpop.f32.mrf.mxu1 }
 0x36c   : > { %v966_v5 = vmax.f32 %v964_v56, %v965_v63  ;;  %v1141_v7 = vmax.f32 %v1139_v60, %v1140_v3  ;;  %v1311_v10 = vpop.f32.mrf.mxu1  ;;  %v1161_v56 = vpop.permute.xlu0 %1160 }
 0x36d   : > { %v1312_v11 = vadd.f32 %v1311_v10, %v1272_v8  ;;  %v1166_v58 = vsel %vm804_vm3, %v1161_v56, 0  ;;  %v1340_v63 = vpop.permute.xlu1 %1339 }
 0x36e   : > { %v967_v12 = vsub.f32 %v959_v42, %v966_v5  ;;  %v1142_v14 = vrot.slane %v1141_v7, 2  ;;  %v1651_v15 = vpop.f32.mrf.mxu1  ;;  %v1345_v4 = vsel %vm804_vm3, %v1340_v63, 0 }
 0x36f   : > { %v1317_v16 = vadd.f32 %v1312_v11, %v1935_v59 }
 0x370   : > { %v968_v17 = vmul.f32 1.442695, %v967_v12  ;;  %v1143_v9 = vmax.f32 %v1141_v7, %v1142_v14  ;;  %v1314_v18 = vpop.f32.mrf.mxu1 }
 0x371   : > { %v1318_v19 = vsel %vm770_vm11, %v1317_v16, -inf }
 0x372   : > { %1697 = vpow2.f32 %v968_v17  ;;  %v1144_v40 = vrot.slane %v1143_v9, 1  ;;  %v1319_v20 = vrot.slane %v1318_v19, 4  ;;  %v1652_v13 = vpop.f32.mrf.mxu1 }
 0x374   : > { %v1145_v21 = vmax.f32 %v1143_v9, %v1144_v40  ;;  %v1320_v22 = vmax.f32 %v1318_v19, %v1319_v20 }
 0x376   : > { %v1146_v23 = vsub.f32 %v1138_v55, %v1145_v21  ;;  %v1321_v25 = vrot.slane %v1320_v22, 2 }
 0x378   : > { %v1147_v26 = vmul.f32 1.442695, %v1146_v23  ;;  %v1322_v27 = vmax.f32 %v1320_v22, %v1321_v25 }
 0x37a   : > { %1699 = vpow2.f32 %v1147_v26  ;;  %v1323_v28 = vrot.slane %v1322_v27, 1 }
 0x37c   : > { %v1324_v29 = vmax.f32 %v1322_v27, %v1323_v28 }
 0x37e   : > { %v1325_v1 = vsub.f32 %v1317_v16, %v1324_v29 }
 0x37f   : > { %v1698_v59 = vpop.eup %1697 }
 0x380   : > { %v970_v0 = vsel %vm770_vm11, %v1698_v59, 0.0  ;;  %v1326_v30 = vmul.f32 1.442695, %v1325_v1 }
 0x381   : > { %v971_v32 = vrot.slane %v970_v0, 4 }
 0x382   : > { %1701 = vpow2.f32 %v1326_v30 }
 0x383   : > { %v972_v6 = vadd.f32 %v971_v32, %v970_v0 }
 0x385   : > { %v973_v35 = vrot.slane %v972_v6, 2 }
 0x387   : > { %v1700_v36 = vpop.eup %1699  ;;  %v974_v37 = vadd.f32 %v973_v35, %v972_v6 }
 0x388   : > { %v1149_v38 = vsel %vm770_vm11, %v1700_v36, 0.0 }
 0x389   : > { %v975_v39 = vrot.slane %v974_v37, 1  ;;  %v1150_v2 = vrot.slane %v1149_v38, 4 }
 0x38b   : > { %v976_v41 = vadd.f32 %v975_v39, %v974_v37  ;;  %v1151_v42 = vadd.f32 %v1150_v2, %v1149_v38 }
 0x38d   : > { %1703 = vrcp.f32 %v976_v41  ;;  %v1152_v43 = vrot.slane %v1151_v42, 2 }
 0x38f   : > { %v1702_v44 = vpop.eup %1701  ;;  %v1153_v45 = vadd.f32 %v1152_v43, %v1151_v42 }
 0x390   : > { %v1328_v46 = vsel %vm770_vm11, %v1702_v44, 0.0 }
 0x391   : > { %v1154_v48 = vrot.slane %v1153_v45, 1  ;;  %v1329_v49 = vrot.slane %v1328_v46, 4 }
 0x393   : > { %v1155_v50 = vadd.f32 %v1154_v48, %v1153_v45  ;;  %v1330_v51 = vadd.f32 %v1329_v49, %v1328_v46 }
 0x395   : > { %1705 = vrcp.f32 %v1155_v50  ;;  %v1331_v31 = vrot.slane %v1330_v51, 2 }
 0x397   : > { %v1332_v52 = vadd.f32 %v1331_v31, %v1330_v51 }
 0x399   : > { %v1333_v53 = vrot.slane %v1332_v52, 1 }
 0x39a   : > { %v1704_v47 = vpop.eup %1703 }
 0x39b   : > { %v978_v54 = vmul.f32 %v1704_v47, %v1698_v59  ;;  %v1334_v55 = vadd.f32 %v1333_v53, %v1332_v52 }
 0x39d   : > { %1707 = vrcp.f32 %v1334_v55  ;;  %v979_v57 = vmul.f32 %v1995_v24, %v978_v54 }
 0x39f   : > { %v980_v60 = vpack.c.bf16 %v979_v57, %v979_v57 }
 0x3a1   : > { %1632 = vmatmul.mubr.msk.bf16.vlgmr.msra.gmra.mxu0 %vm770_vm11, %v980_v60 }
 0x3a2   : > { %v1706_v61 = vpop.eup %1705  ;;  %1642 = vmatpush3.bf16.msra.mxu0 %v1166_v58  ;;  %1643 = vmatprep.mubr.msk.bf16.mxu0 %vm1718_vm0, %v1717_v34 }
 0x3a3   : > { %1653 = vmatprep.subr.bf16.mxu0 %v1717_v34  ;;  %v1157_v62 = vmul.f32 %v1706_v61, %v1700_v36 }
 0x3a5   : > { %v1158_v3 = vmul.f32 %v1995_v24, %v1157_v62 }
 0x3a7   : > { %v1159_v5 = vpack.c.bf16 %v1158_v3, %v1158_v3 }
 0x3a9   : > { %1644 = vmatmul.mubr.msk.bf16.vlgmr.msra.gmra.mxu0 %vm770_vm11, %v1159_v5 }
 0x3aa   : > { %v1708_v7 = vpop.eup %1707  ;;  %1654 = vmatpush3.bf16.msra.mxu0 %v1345_v4  ;;  %1655 = vmatprep.mubr.msk.bf16.mxu0 %vm1718_vm0, %v1717_v34 }
 0x3ab   : > { %v1336_v8 = vmul.f32 %v1708_v7, %v1702_v44 }
 0x3ad   : > { %v1337_v10 = vmul.f32 %v1995_v24, %v1336_v8 }
 0x3af   : > { %v1338_v11 = vpack.c.bf16 %v1337_v10, %v1337_v10 }
 0x3b1   : > { %1656 = vmatmul.mubr.msk.bf16.vlgmr.msra.gmra.mxu0 %vm770_vm11, %v1338_v11 }
 0x461   : > { %v1023_v12 = vpop.f32.mrf.mxu0 }
 0x462   : > { %1388 = vrot.lane.b32.xlu0 %v1023_v12, %s1725_s16 }
 0x463   : > { %v1633_v14 = vpop.f32.mrf.mxu0 }
 0x465   : > { %v1026_v15 = vpop.f32.mrf.mxu0 }
 0x467   : > { %v1634_v16 = vpop.f32.mrf.mxu0 }
 0x469   : > { %v1202_v17 = vpop.f32.mrf.mxu0 }
 0x46a   : > { %1392 = vrot.lane.b32.xlu1 %v1202_v17, %s1721_s14 }
 0x46b   : > { %v1645_v9 = vpop.f32.mrf.mxu0 }
 0x46d   : > { %v1205_v18 = vpop.f32.mrf.mxu0 }
 0x46f   : > { %v1646_v19 = vpop.f32.mrf.mxu0 }
 0x471   : > { %v1381_v34 = vpop.f32.mrf.mxu0 }
 0x472   : > { %1396 = vrot.lane.b32.xlu0 %v1381_v34, %s1722_s15 }
 0x473   : > { %v1657_v24 = vpop.f32.mrf.mxu0 }
 0x475   : > { %v1384_v40 = vpop.f32.mrf.mxu0 }
 0x477   : > { %v1658_v20 = vpop.f32.mrf.mxu0 }
 0x4d4   : > { %v1389_v13 = vpop.permute.xlu0 %1388 }
 0x4d5   : > { %v1399_v22 = vsel %vm559_vm1, %v2021_v33, %v1389_v13 }
 0x4dc   : > { %v1393_v21 = vpop.permute.xlu1 %1392 }
 0x4dd   : > { %v1401_v23 = vsel %vm1400_vm12, %v1399_v22, %v1393_v21 }
 0x4e4   : > { %v1397_v25 = vpop.permute.xlu0 %1396 }
 0x4e5   : > { %v1403_v26 = vsel %vm1402_vm13, %v1401_v23, %v1397_v25 }
 0x4e6   : > { %v1404_v27 = vpack.c.bf16 %v1403_v26, %v1403_v26 }
 0x4e8   : > { %1405 = vst [vmem:[%s398_s21] sm:$0xf] %v1404_v27 }
 0x4e9 PF: > { %s19_s30 = sadd.s32 1, %s1715_s30  }
 0x4ea   : > { %p16_p4 = scmp.ge.s32.totalorder %s19_s30, 4  }
 0x4ec   :  { %18 = sbr.rel (!%p16_p4) target bundleno = 1 (0x1), region = 98 }

// kernel: fwd.9
= control target key start
LH: loop header
LB: loop body
LE: loop exit
PB: predicated region body
PF: predicated region fallthrough
CT: control target
= control target key end

     0   :  { %v163_v0 = vmov 0.0   ;;  %vm164_vm0 = vmmov 0   ;;  %s245_s1 = inlined_call_operand.vmem [shape: f32[128,128], index: 1, kind: input, shape index: {}]   ;;  %s246_s0 = inlined_call_operand.vmem [shape: bf16[16,128], index: 0, kind: input, shape index: {}]   ;;  %s247_s2 = inlined_call_operand.vmem [shape: f32[1,128], index: 2, kind: input, shape index: {}]   ;;  %s248_s3 = inlined_call_operand.vmem [shape: f32[16,128], index: 3, kind: output, shape index: {}]  }
   0x1   :  { %132 = vmatprep.subr.bf16.mxu0 %v163_v0  ;;  %v31_v1 = vld [vmem:[%s245_s1 + $0x70] sm:$0xff]  ;;  %v32_v2 = vld [vmem:[%s245_s1 + $0x78] sm:$0xff]  ;;  %v29_v3 = vld [vmem:[%s245_s1 + $0x60] sm:$0xff]  ;;  %148 = vmatprep.mubr.msk.bf16.mxu0 %vm164_vm0, %v163_v0 }
   0x2   :  { %v40_v4 = vpack.c.bf16 %v32_v2, %v31_v1  ;;  %v30_v5 = vld [vmem:[%s245_s1 + $0x68] sm:$0xff]  ;;  %v27_v7 = vld [vmem:[%s245_s1 + $0x50] sm:$0xff]  ;;  %v28_v8 = vld [vmem:[%s245_s1 + $0x58] sm:$0xff] }
   0x3   :  { %v39_v6 = vpack.c.bf16 %v30_v5, %v29_v3  ;;  %v38_v9 = vpack.c.bf16 %v28_v8, %v27_v7  ;;  %v25_v10 = vld [vmem:[%s245_s1 + $0x40] sm:$0xff]  ;;  %v26_v11 = vld [vmem:[%s245_s1 + $0x48] sm:$0xff]  ;;  %v23_v13 = vld [vmem:[%s245_s1 + $0x30] sm:$0xff] }
   0x4   :  { %133 = vmatpush3.bf16.msra.mxu0 %v40_v4  ;;  %v37_v12 = vpack.c.bf16 %v26_v11, %v25_v10  ;;  %v24_v14 = vld [vmem:[%s245_s1 + $0x38] sm:$0xff]  ;;  %v21_v16 = vld [vmem:[%s245_s1 + $0x20] sm:$0xff]  ;;  %v22_v17 = vld [vmem:[%s245_s1 + $0x28] sm:$0xff] }
   0x5   :  { %134 = vmatprep.subr.bf16.mxu0 %v163_v0  ;;  %v36_v15 = vpack.c.bf16 %v24_v14, %v23_v13  ;;  %v35_v18 = vpack.c.bf16 %v22_v17, %v21_v16  ;;  %v19_v19 = vld [vmem:[%s245_s1 + $0x10] sm:$0xff]  ;;  %v20_v20 = vld [vmem:[%s245_s1 + $0x18] sm:$0xff]  ;;  %v17_v22 = vld [vmem:[%s245_s1] sm:$0xff] }
   0x6   :  { %v34_v21 = vpack.c.bf16 %v20_v20, %v19_v19  ;;  %v18_v23 = vld [vmem:[%s245_s1 + $0x8] sm:$0xff]  ;;  %v154_v25 = vld [vmem:[%s246_s0] sm:$0xff]  }
   0x7   :  { %v33_v24 = vpack.c.bf16 %v18_v23, %v17_v22  ;;  %v121_v26 = vld [vmem:[%s247_s2] ss:$0 sm:$0xff] }
   0x8   :  { %135 = vmatpush3.bf16.msra.mxu0 %v39_v6 }
   0x9   :  { %136 = vmatprep.subr.bf16.mxu0 %v163_v0 }
   0xc   :  { %137 = vmatpush3.bf16.msra.mxu0 %v38_v9 }
   0xd   :  { %138 = vmatprep.subr.bf16.mxu0 %v163_v0 }
  0x10   :  { %139 = vmatpush3.bf16.msra.mxu0 %v37_v12 }
  0x11   :  { %140 = vmatprep.subr.bf16.mxu0 %v163_v0 }
  0x14   :  { %141 = vmatpush3.bf16.msra.mxu0 %v36_v15 }
  0x15   :  { %142 = vmatprep.subr.bf16.mxu0 %v163_v0 }
  0x18   :  { %143 = vmatpush3.bf16.msra.mxu0 %v35_v18 }
  0x19   :  { %144 = vmatprep.subr.bf16.mxu0 %v163_v0 }
  0x1c   :  { %145 = vmatpush3.bf16.msra.mxu0 %v34_v21 }
  0x1d   :  { %146 = vmatprep.subr.bf16.mxu0 %v163_v0 }
  0x20   :  { %147 = vmatpush3.bf16.msra.mxu0 %v33_v24 }
  0x23   :  { %149 = vmatmul.mubr.bf16.vlgmr.msra.gmra.mxu0 %v154_v25 }
  0xe3   :  { %v88_v27 = vpop.f32.mrf.mxu0 }
  0xe4   :  { %v89_v28 = vadd.f32 %v121_v26, %v88_v27 }
  0xe5   :  { %v150_v29 = vpop.f32.mrf.mxu0 }
  0xe6   :  { %95 = vmax.xlane.f32.xlu0 %v89_v28 }
  0xe7   :  { %v91_v30 = vpop.f32.mrf.mxu0 }
  0xe8   :  { %v92_v31 = vadd.f32 %v121_v26, %v91_v30 }
  0xe9   :  { %v151_v32 = vpop.f32.mrf.mxu0 }
  0xea   :  { %97 = vmax.xlane.f32.xlu0 %v92_v31 }
 0x16f   :  { %v96_v33 = vpop.xlane.xlu0 %95 }
 0x170   :  { %v99_v34 = vsub.f32 %v89_v28, %v96_v33 }
 0x172   :  { %v101_v35 = vmul.f32 1.442695, %v99_v34 }
 0x173   :  { %v98_v36 = vpop.xlane.xlu0 %97 }
 0x174   :  { %v100_v37 = vsub.f32 %v92_v31, %v98_v36  ;;  %155 = vpow2.f32 %v101_v35 }
 0x176   :  { %v103_v38 = vmul.f32 1.442695, %v100_v37 }
 0x178   :  { %157 = vpow2.f32 %v103_v38 }
 0x181   :  { %v156_v39 = vpop.eup %155 }
 0x182   :  { %105 = vadd.xlane.f32.xlu1 %v156_v39 }
 0x185   :  { %v158_v40 = vpop.eup %157 }
 0x186   :  { %107 = vadd.xlane.f32.xlu1 %v158_v40 }
 0x20b   :  { %v106_v41 = vpop.xlane.xlu1 %105 }
 0x20c   :  { %159 = vlog2.f32 %v106_v41 }
 0x20f   :  { %v108_v42 = vpop.xlane.xlu1 %107 }
 0x210   :  { %161 = vlog2.f32 %v108_v42 }
 0x219   :  { %v160_v43 = vpop.eup %159 }
 0x21a   :  { %v110_v44 = vmul.f32 0.6931472, %v160_v43 }
 0x21c   :  { %v113_v45 = vsub.f32 %v99_v34, %v110_v44 }
 0x21d   :  { %v162_v46 = vpop.eup %161 }
 0x21e   :  { %115 = vst [vmem:[%s248_s3] sm:$0xff] %v113_v45  ;;  %v112_v47 = vmul.f32 0.6931472, %v162_v46 }
 0x220   :  { %v114_v48 = vsub.f32 %v100_v37, %v112_v47 }
 0x222   :  { %116 = vst [vmem:[%s248_s3 + $0x8] sm:$0xff] %v114_v48 }

</bundles_post_ra>
